<compile_context>
chip_gen: v7x
topology: tpu7x:2x2x1
jax: 0.10.0
libtpu: 0.0.40
codegen_flags: <defaults>
</compile_context>

<pallas_src>
import numpy as np

import jax
import jax.numpy as jnp
from jax.experimental import pallas as pl
from jax.experimental.pallas import tpu as pltpu

LANE = 128   # TPU lane width
HID = 256    # NAF hidden width (already MXU-aligned)


def _naf_fused_kernel(obs_ref, act_ref,
                      w_obs_ref, b_obs_ref,
                      w_act_ref, b_act_ref,
                      w_h_obs_ref, w_h_act_ref, b_h_ref,
                      w_v_ref, b_v_ref,
                      w_mu_ref, b_mu_ref,
                      w_l_ref, b_l_ref,
                      g_ref, h_ref,
                      q_ref):
    f32 = jnp.float32

    def lrelu(x):  # F.leaky_relu default slope = 0.01, keep elementwise in f32
        return jnp.where(x >= 0, x, 0.01 * x)

    obs = obs_ref[...]          # (TB, 128)  lanes >= obs_dim are zero
    act = act_ref[...]          # (TB, 128)  lanes >= act_dim are zero

    # Trunk: two Linear(·,256) + leaky_relu, concat folded into split matmuls.
    obs_h = lrelu(jnp.dot(obs, w_obs_ref[...], preferred_element_type=f32)
                  + b_obs_ref[...])
    act_h = lrelu(jnp.dot(act, w_act_ref[...], preferred_element_type=f32)
                  + b_act_ref[...])
    out = lrelu(jnp.dot(obs_h, w_h_obs_ref[...], preferred_element_type=f32)
                + jnp.dot(act_h, w_h_act_ref[...], preferred_element_type=f32)
                + b_h_ref[...])                                   # (TB, 256)

    # Heads (all lane-padded to 128 wide).
    v_full = jnp.dot(out, w_v_ref[...], preferred_element_type=f32) + b_v_ref[...]
    mu = jnp.tanh(jnp.dot(out, w_mu_ref[...], preferred_element_type=f32)
                  + b_mu_ref[...])                                # (TB, 128)
    l_flat = jnp.dot(out, w_l_ref[...], preferred_element_type=f32) + b_l_ref[...]

    # NAF quadratic advantage:  A = -0.5 * || L^T (a - mu) ||^2  with L lower-tri.
    # G[i, k] = 1 iff i == k // A  and  (k // A) >= (k % A)  (tril folded in)
    # H[k, j] = 1 iff j == k %  A
    diff = act - mu                                               # pads stay zero
    dg = jnp.dot(diff, g_ref[...], preferred_element_type=f32)    # diff[b, i(k)]*tril
    y = jnp.dot(dg * l_flat, h_ref[...], preferred_element_type=f32)  # (L^T diff)_j
    a_term = -0.5 * jnp.sum(y * y, axis=-1, keepdims=True)        # (TB, 1)

    # Q = A - V ; pad lanes of v_full are 0 so lane 0 holds the real Q.
    q_ref[...] = (a_term - v_full).astype(q_ref.dtype)


def _pad2(a, rows, cols):
    a = jnp.asarray(a, jnp.float32)
    r, c = a.shape
    return jnp.zeros((rows, cols), jnp.float32).at[:r, :c].set(a)


def naf_forward(observation, action, params, *, tb=8):
    """Pallas TPU forward for QNetwork_NAF. Returns Q with shape (B, 1)."""
    B, obs_dim = observation.shape
    _, act_dim = action.shape
    assert B % tb == 0, "batch must be a multiple of the batch tile"

    # --- host-side (free XLA) padding to lane-dense layouts -------------------
    obs_p = _pad2(observation, B, LANE)
    act_p = _pad2(action, B, LANE)

    w_obs = _pad2(params["w_obs"], LANE, HID)          # (128, 256)
    w_act = _pad2(params["w_act"], LANE, HID)          # (128, 256)
    w_h = jnp.asarray(params["w_h"], jnp.float32)      # (512, 256)
    w_h_obs, w_h_act = w_h[:HID], w_h[HID:]            # 2 x (256, 256)
    w_v = _pad2(params["w_v"], HID, LANE)              # (256, 128)
    w_mu = _pad2(params["w_mu"], HID, LANE)            # (256, 128)
    w_l = _pad2(params["w_l"], HID, LANE)              # (256, 128)

    b_obs = jnp.asarray(params["b_obs"], jnp.float32).reshape(1, HID)
    b_act = jnp.asarray(params["b_act"], jnp.float32).reshape(1, HID)
    b_h = jnp.asarray(params["b_h"], jnp.float32).reshape(1, HID)
    b_v = _pad2(jnp.asarray(params["b_v"]).reshape(1, -1), 1, LANE)
    b_mu = _pad2(jnp.asarray(params["b_mu"]).reshape(1, -1), 1, LANE)
    b_l = _pad2(jnp.asarray(params["b_l"]).reshape(1, -1), 1, LANE)

    # Constant gather / group-sum matrices (tril folded into G).
    k = np.arange(LANE)
    valid = k < act_dim * act_dim
    i_of_k = k // act_dim
    j_of_k = k % act_dim
    G = np.zeros((LANE, LANE), np.float32)
    G[i_of_k[valid], k[valid]] = (i_of_k[valid] >= j_of_k[valid]).astype(np.float32)
    H = np.zeros((LANE, LANE), np.float32)
    H[k[valid], j_of_k[valid]] = 1.0
    G = jnp.asarray(G)
    H = jnp.asarray(H)

    # --- specs ----------------------------------------------------------------
    row_spec = pl.BlockSpec((tb, LANE), lambda i: (i, 0))

    def full(shape):
        return pl.BlockSpec(shape, lambda i: (0, 0))

    in_specs = [
        row_spec,                 # obs_p
        row_spec,                 # act_p
        full((LANE, HID)),        # w_obs
        full((1, HID)),           # b_obs
        full((LANE, HID)),        # w_act
        full((1, HID)),           # b_act
        full((HID, HID)),         # w_h_obs
        full((HID, HID)),         # w_h_act
        full((1, HID)),           # b_h
        full((HID, LANE)),        # w_v
        full((1, LANE)),          # b_v
        full((HID, LANE)),        # w_mu
        full((1, LANE)),          # b_mu
        full((HID, LANE)),        # w_l
        full((1, LANE)),          # b_l
        full((LANE, LANE)),       # G
        full((LANE, LANE)),       # H
    ]

    q_padded = pl.pallas_call(
        _naf_fused_kernel,
        out_shape=jax.ShapeDtypeStruct((B, LANE), jnp.float32),
        grid_spec=pltpu.PrefetchScalarGridSpec(
            num_scalar_prefetch=0,
            grid=(B // tb,),
            in_specs=in_specs,
            out_specs=row_spec,
        ),
        compiler_params=pltpu.CompilerParams(
            dimension_semantics=("parallel",),
        ),
    )(obs_p, act_p,
      w_obs, b_obs, w_act, b_act,
      w_h_obs, w_h_act, b_h,
      w_v, b_v, w_mu, b_mu, w_l, b_l,
      G, H)

    return q_padded[:, :1]        # lane 0 holds Q; slicing is a free XLA op


# ------------------------------- reference / demo ------------------------------

def init_params(key, obs_dim, act_dim):
    """PyTorch nn.Linear default init, weights stored as (in, out)."""
    def linear(k, fan_in, fan_out):
        k1, k2 = jax.random.split(k)
        bound = 1.0 / np.sqrt(fan_in)
        w = jax.random.uniform(k1, (fan_in, fan_out), jnp.float32, -bound, bound)
        b = jax.random.uniform(k2, (fan_out,), jnp.float32, -bound, bound)
        return w, b

    keys = jax.random.split(key, 6)
    p = {}
    p["w_obs"], p["b_obs"] = linear(keys[0], obs_dim, HID)
    p["w_act"], p["b_act"] = linear(keys[1], act_dim, HID)
    p["w_h"], p["b_h"] = linear(keys[2], 2 * HID, HID)
    p["w_v"], p["b_v"] = linear(keys[3], HID, 1)
    p["w_mu"], p["b_mu"] = linear(keys[4], HID, act_dim)
    p["w_l"], p["b_l"] = linear(keys[5], HID, act_dim * act_dim)
    return p


def naf_reference_np(obs, act, params):
    """float64 numpy reference of the intended NAF forward."""
    p = {k: np.asarray(v, np.float64) for k, v in params.items()}
    obs = np.asarray(obs, np.float64)
    act = np.asarray(act, np.float64)
    lrelu = lambda x: np.where(x >= 0, x, 0.01 * x)
    oh = lrelu(obs @ p["w_obs"] + p["b_obs"])
    ah = lrelu(act @ p["w_act"] + p["b_act"])
    sa = np.concatenate([oh, ah], axis=-1)
    out = lrelu(sa @ p["w_h"] + p["b_h"])
    V = out @ p["w_v"] + p["b_v"]
    mu = np.tanh(out @ p["w_mu"] + p["b_mu"])
    a_d = act.shape[-1]
    L = (out @ p["w_l"] + p["b_l"]).reshape(-1, a_d, a_d)
    L = L * np.tril(np.ones((a_d, a_d)))[None]
    P = L @ np.transpose(L, (0, 2, 1))
    diff = act - mu
    A = -0.5 * np.einsum("bi,bij,bj->b", diff, P, diff)[:, None]
    return A - V


if __name__ == "__main__":
    key = jax.random.PRNGKey(0)
    k_obs, k_act, k_par = jax.random.split(key, 3)

    B, OBS_DIM, ACT_DIM = 16, 8, 2          # lunar-lander-continuous sizes
    obs = jax.random.normal(k_obs, (B, OBS_DIM), dtype=jnp.float32)
    act = jnp.clip(jax.random.normal(k_act, (B, ACT_DIM), dtype=jnp.float32), -1.0, 1.0)
    params = init_params(k_par, OBS_DIM, ACT_DIM)

    q = naf_forward(obs, act, params)
    q = jax.block_until_ready(q)

    ref = naf_reference_np(np.asarray(obs), np.asarray(act),
                           {k: np.asarray(v) for k, v in params.items()})

    assert q.shape == (B, 1), q.shape
    np.testing.assert_allclose(np.asarray(q), ref, rtol=2e-2, atol=2e-2)

    print("KERNEL_OK")
</pallas_src>

<mosaic_0001>
module attributes {stable_mosaic.version = 11 : i64} {
  func.func @_naf_fused_kernel(%arg0: i32, %arg1: memref<8x128xf32, #tpu.memory_space<vmem>>, %arg2: memref<8x128xf32, #tpu.memory_space<vmem>>, %arg3: memref<128x256xf32, #tpu.memory_space<vmem>>, %arg4: memref<1x256xf32, #tpu.memory_space<vmem>>, %arg5: memref<128x256xf32, #tpu.memory_space<vmem>>, %arg6: memref<1x256xf32, #tpu.memory_space<vmem>>, %arg7: memref<256x256xf32, #tpu.memory_space<vmem>>, %arg8: memref<256x256xf32, #tpu.memory_space<vmem>>, %arg9: memref<1x256xf32, #tpu.memory_space<vmem>>, %arg10: memref<256x128xf32, #tpu.memory_space<vmem>>, %arg11: memref<1x128xf32, #tpu.memory_space<vmem>>, %arg12: memref<256x128xf32, #tpu.memory_space<vmem>>, %arg13: memref<1x128xf32, #tpu.memory_space<vmem>>, %arg14: memref<256x128xf32, #tpu.memory_space<vmem>>, %arg15: memref<1x128xf32, #tpu.memory_space<vmem>>, %arg16: memref<128x128xf32, #tpu.memory_space<vmem>>, %arg17: memref<128x128xf32, #tpu.memory_space<vmem>>, %arg18: memref<8x128xf32, #tpu.memory_space<vmem>>) attributes {dimension_semantics = [#tpu.dimension_semantics<parallel>], iteration_bounds = array<i64: 2>, scalar_prefetch = 0 : i64, scratch_operands = 0 : i64, tpu.core_type = #tpu.core_type<tc>, window_params = [{transform_indices = @transform_0, window_bounds = array<i64: 8, 128>}, {transform_indices = @transform_1, window_bounds = array<i64: 8, 128>}, {pipeline_mode = #tpu.pipeline_mode<synchronous>, transform_indices = @transform_2, window_bounds = array<i64: 128, 256>}, {pipeline_mode = #tpu.pipeline_mode<synchronous>, transform_indices = @transform_3, window_bounds = array<i64: 1, 256>}, {pipeline_mode = #tpu.pipeline_mode<synchronous>, transform_indices = @transform_4, window_bounds = array<i64: 128, 256>}, {pipeline_mode = #tpu.pipeline_mode<synchronous>, transform_indices = @transform_5, window_bounds = array<i64: 1, 256>}, {pipeline_mode = #tpu.pipeline_mode<synchronous>, transform_indices = @transform_6, window_bounds = array<i64: 256, 256>}, {pipeline_mode = #tpu.pipeline_mode<synchronous>, transform_indices = @transform_7, window_bounds = array<i64: 256, 256>}, {pipeline_mode = #tpu.pipeline_mode<synchronous>, transform_indices = @transform_8, window_bounds = array<i64: 1, 256>}, {pipeline_mode = #tpu.pipeline_mode<synchronous>, transform_indices = @transform_9, window_bounds = array<i64: 256, 128>}, {pipeline_mode = #tpu.pipeline_mode<synchronous>, transform_indices = @transform_10, window_bounds = array<i64: 1, 128>}, {pipeline_mode = #tpu.pipeline_mode<synchronous>, transform_indices = @transform_11, window_bounds = array<i64: 256, 128>}, {pipeline_mode = #tpu.pipeline_mode<synchronous>, transform_indices = @transform_12, window_bounds = array<i64: 1, 128>}, {pipeline_mode = #tpu.pipeline_mode<synchronous>, transform_indices = @transform_13, window_bounds = array<i64: 256, 128>}, {pipeline_mode = #tpu.pipeline_mode<synchronous>, transform_indices = @transform_14, window_bounds = array<i64: 1, 128>}, {pipeline_mode = #tpu.pipeline_mode<synchronous>, transform_indices = @transform_15, window_bounds = array<i64: 128, 128>}, {pipeline_mode = #tpu.pipeline_mode<synchronous>, transform_indices = @transform_16, window_bounds = array<i64: 128, 128>}, {transform_indices = @transform_17, window_bounds = array<i64: 8, 128>}]} {
    %c0 = arith.constant 0 : index
    %c0_0 = arith.constant 0 : index
    %0 = vector.load %arg1[%c0, %c0_0] : memref<8x128xf32, #tpu.memory_space<vmem>>, vector<8x128xf32>
    %c0_1 = arith.constant 0 : index
    %c0_2 = arith.constant 0 : index
    %1 = vector.load %arg2[%c0_1, %c0_2] : memref<8x128xf32, #tpu.memory_space<vmem>>, vector<8x128xf32>
    %c0_3 = arith.constant 0 : index
    %c0_4 = arith.constant 0 : index
    %2 = vector.load %arg3[%c0_3, %c0_4] : memref<128x256xf32, #tpu.memory_space<vmem>>, vector<128x256xf32>
    %cst = arith.constant dense<0.000000e+00> : vector<8x256xf32>
    %3 = tpu.matmul %0, %2, %cst {dimension_numbers = #tpu.dot_dimension_numbers<[1], [0], [0], [1], [0, 0, 1, 1], [], []>} : vector<8x128xf32>, vector<128x256xf32>, vector<8x256xf32> -> vector<8x256xf32>
    %c0_5 = arith.constant 0 : index
    %c0_6 = arith.constant 0 : index
    %4 = vector.load %arg4[%c0_5, %c0_6] : memref<1x256xf32, #tpu.memory_space<vmem>>, vector<1x256xf32>
    %5 = vector.broadcast %4 : vector<1x256xf32> to vector<8x256xf32>
    %6 = arith.addf %3, %5 : vector<8x256xf32>
    %cst_7 = arith.constant 0.000000e+00 : f32
    %7 = vector.broadcast %cst_7 : f32 to vector<8x256xf32>
    %8 = arith.cmpf oge, %6, %7 : vector<8x256xf32>
    %cst_8 = arith.constant 0.00999999977 : f32
    %9 = vector.broadcast %cst_8 : f32 to vector<8x256xf32>
    %10 = arith.mulf %9, %6 : vector<8x256xf32>
    %11 = arith.select %8, %6, %10 : vector<8x256xi1>, vector<8x256xf32>
    %c0_9 = arith.constant 0 : index
    %c0_10 = arith.constant 0 : index
    %12 = vector.load %arg5[%c0_9, %c0_10] : memref<128x256xf32, #tpu.memory_space<vmem>>, vector<128x256xf32>
    %cst_11 = arith.constant dense<0.000000e+00> : vector<8x256xf32>
    %13 = tpu.matmul %1, %12, %cst_11 {dimension_numbers = #tpu.dot_dimension_numbers<[1], [0], [0], [1], [0, 0, 1, 1], [], []>} : vector<8x128xf32>, vector<128x256xf32>, vector<8x256xf32> -> vector<8x256xf32>
    %c0_12 = arith.constant 0 : index
    %c0_13 = arith.constant 0 : index
    %14 = vector.load %arg6[%c0_12, %c0_13] : memref<1x256xf32, #tpu.memory_space<vmem>>, vector<1x256xf32>
    %15 = vector.broadcast %14 : vector<1x256xf32> to vector<8x256xf32>
    %16 = arith.addf %13, %15 : vector<8x256xf32>
    %cst_14 = arith.constant 0.000000e+00 : f32
    %17 = vector.broadcast %cst_14 : f32 to vector<8x256xf32>
    %18 = arith.cmpf oge, %16, %17 : vector<8x256xf32>
    %cst_15 = arith.constant 0.00999999977 : f32
    %19 = vector.broadcast %cst_15 : f32 to vector<8x256xf32>
    %20 = arith.mulf %19, %16 : vector<8x256xf32>
    %21 = arith.select %18, %16, %20 : vector<8x256xi1>, vector<8x256xf32>
    %c0_16 = arith.constant 0 : index
    %c0_17 = arith.constant 0 : index
    %22 = vector.load %arg7[%c0_16, %c0_17] : memref<256x256xf32, #tpu.memory_space<vmem>>, vector<256x256xf32>
    %cst_18 = arith.constant dense<0.000000e+00> : vector<8x256xf32>
    %23 = tpu.matmul %11, %22, %cst_18 {dimension_numbers = #tpu.dot_dimension_numbers<[1], [0], [0], [1], [0, 0, 1, 1], [], []>} : vector<8x256xf32>, vector<256x256xf32>, vector<8x256xf32> -> vector<8x256xf32>
    %c0_19 = arith.constant 0 : index
    %c0_20 = arith.constant 0 : index
    %24 = vector.load %arg8[%c0_19, %c0_20] : memref<256x256xf32, #tpu.memory_space<vmem>>, vector<256x256xf32>
    %cst_21 = arith.constant dense<0.000000e+00> : vector<8x256xf32>
    %25 = tpu.matmul %21, %24, %cst_21 {dimension_numbers = #tpu.dot_dimension_numbers<[1], [0], [0], [1], [0, 0, 1, 1], [], []>} : vector<8x256xf32>, vector<256x256xf32>, vector<8x256xf32> -> vector<8x256xf32>
    %26 = arith.addf %23, %25 : vector<8x256xf32>
    %c0_22 = arith.constant 0 : index
    %c0_23 = arith.constant 0 : index
    %27 = vector.load %arg9[%c0_22, %c0_23] : memref<1x256xf32, #tpu.memory_space<vmem>>, vector<1x256xf32>
    %28 = vector.broadcast %27 : vector<1x256xf32> to vector<8x256xf32>
    %29 = arith.addf %26, %28 : vector<8x256xf32>
    %cst_24 = arith.constant 0.000000e+00 : f32
    %30 = vector.broadcast %cst_24 : f32 to vector<8x256xf32>
    %31 = arith.cmpf oge, %29, %30 : vector<8x256xf32>
    %cst_25 = arith.constant 0.00999999977 : f32
    %32 = vector.broadcast %cst_25 : f32 to vector<8x256xf32>
    %33 = arith.mulf %32, %29 : vector<8x256xf32>
    %34 = arith.select %31, %29, %33 : vector<8x256xi1>, vector<8x256xf32>
    %c0_26 = arith.constant 0 : index
    %c0_27 = arith.constant 0 : index
    %35 = vector.load %arg10[%c0_26, %c0_27] : memref<256x128xf32, #tpu.memory_space<vmem>>, vector<256x128xf32>
    %cst_28 = arith.constant dense<0.000000e+00> : vector<8x128xf32>
    %36 = tpu.matmul %34, %35, %cst_28 {dimension_numbers = #tpu.dot_dimension_numbers<[1], [0], [0], [1], [0, 0, 1, 1], [], []>} : vector<8x256xf32>, vector<256x128xf32>, vector<8x128xf32> -> vector<8x128xf32>
    %c0_29 = arith.constant 0 : index
    %c0_30 = arith.constant 0 : index
    %37 = vector.load %arg11[%c0_29, %c0_30] : memref<1x128xf32, #tpu.memory_space<vmem>>, vector<1x128xf32>
    %38 = vector.broadcast %37 : vector<1x128xf32> to vector<8x128xf32>
    %39 = arith.addf %36, %38 : vector<8x128xf32>
    %c0_31 = arith.constant 0 : index
    %c0_32 = arith.constant 0 : index
    %40 = vector.load %arg12[%c0_31, %c0_32] : memref<256x128xf32, #tpu.memory_space<vmem>>, vector<256x128xf32>
    %cst_33 = arith.constant dense<0.000000e+00> : vector<8x128xf32>
    %41 = tpu.matmul %34, %40, %cst_33 {dimension_numbers = #tpu.dot_dimension_numbers<[1], [0], [0], [1], [0, 0, 1, 1], [], []>} : vector<8x256xf32>, vector<256x128xf32>, vector<8x128xf32> -> vector<8x128xf32>
    %c0_34 = arith.constant 0 : index
    %c0_35 = arith.constant 0 : index
    %42 = vector.load %arg13[%c0_34, %c0_35] : memref<1x128xf32, #tpu.memory_space<vmem>>, vector<1x128xf32>
    %43 = vector.broadcast %42 : vector<1x128xf32> to vector<8x128xf32>
    %44 = arith.addf %41, %43 : vector<8x128xf32>
    %45 = math.tanh %44 : vector<8x128xf32>
    %c0_36 = arith.constant 0 : index
    %c0_37 = arith.constant 0 : index
    %46 = vector.load %arg14[%c0_36, %c0_37] : memref<256x128xf32, #tpu.memory_space<vmem>>, vector<256x128xf32>
    %cst_38 = arith.constant dense<0.000000e+00> : vector<8x128xf32>
    %47 = tpu.matmul %34, %46, %cst_38 {dimension_numbers = #tpu.dot_dimension_numbers<[1], [0], [0], [1], [0, 0, 1, 1], [], []>} : vector<8x256xf32>, vector<256x128xf32>, vector<8x128xf32> -> vector<8x128xf32>
    %c0_39 = arith.constant 0 : index
    %c0_40 = arith.constant 0 : index
    %48 = vector.load %arg15[%c0_39, %c0_40] : memref<1x128xf32, #tpu.memory_space<vmem>>, vector<1x128xf32>
    %49 = vector.broadcast %48 : vector<1x128xf32> to vector<8x128xf32>
    %50 = arith.addf %47, %49 : vector<8x128xf32>
    %51 = arith.subf %1, %45 : vector<8x128xf32>
    %c0_41 = arith.constant 0 : index
    %c0_42 = arith.constant 0 : index
    %52 = vector.load %arg16[%c0_41, %c0_42] : memref<128x128xf32, #tpu.memory_space<vmem>>, vector<128x128xf32>
    %cst_43 = arith.constant dense<0.000000e+00> : vector<8x128xf32>
    %53 = tpu.matmul %51, %52, %cst_43 {dimension_numbers = #tpu.dot_dimension_numbers<[1], [0], [0], [1], [0, 0, 1, 1], [], []>} : vector<8x128xf32>, vector<128x128xf32>, vector<8x128xf32> -> vector<8x128xf32>
    %54 = arith.mulf %53, %50 : vector<8x128xf32>
    %c0_44 = arith.constant 0 : index
    %c0_45 = arith.constant 0 : index
    %55 = vector.load %arg17[%c0_44, %c0_45] : memref<128x128xf32, #tpu.memory_space<vmem>>, vector<128x128xf32>
    %cst_46 = arith.constant dense<0.000000e+00> : vector<8x128xf32>
    %56 = tpu.matmul %54, %55, %cst_46 {dimension_numbers = #tpu.dot_dimension_numbers<[1], [0], [0], [1], [0, 0, 1, 1], [], []>} : vector<8x128xf32>, vector<128x128xf32>, vector<8x128xf32> -> vector<8x128xf32>
    %57 = arith.mulf %56, %56 : vector<8x128xf32>
    %cst_47 = arith.constant dense<0.000000e+00> : vector<8xf32>
    %58 = vector.multi_reduction <add>, %57, %cst_47 [1] : vector<8x128xf32> to vector<8xf32>
    %59 = vector.shape_cast %58 : vector<8xf32> to vector<8x1xf32>
    %cst_48 = arith.constant -5.000000e-01 : f32
    %60 = vector.broadcast %cst_48 : f32 to vector<8x1xf32>
    %61 = arith.mulf %60, %59 : vector<8x1xf32>
    %62 = vector.broadcast %61 : vector<8x1xf32> to vector<8x128xf32>
    %63 = arith.subf %62, %39 : vector<8x128xf32>
    %c0_49 = arith.constant 0 : index
    %c0_50 = arith.constant 0 : index
    %64 = vector.load %arg18[%c0_49, %c0_50] : memref<8x128xf32, #tpu.memory_space<vmem>>, vector<8x128xf32>
    tpu.vector_store %arg18[%c0_49, %c0_50], %63 {strides = array<i32>} : memref<8x128xf32, #tpu.memory_space<vmem>>, vector<8x128xf32>,
    return
  }
  func.func @transform_0(%arg0: i32) -> (i32, i32) {
    %c0_i32 = arith.constant 0 : i32
    %c0_i32_0 = arith.constant 0 : i32
    return %arg0, %c0_i32 : i32, i32
  }
  func.func @transform_1(%arg0: i32) -> (i32, i32) {
    %c0_i32 = arith.constant 0 : i32
    %c0_i32_0 = arith.constant 0 : i32
    return %arg0, %c0_i32 : i32, i32
  }
  func.func @transform_2(%arg0: i32) -> (i32, i32) {
    %c0_i32 = arith.constant 0 : i32
    %c0_i32_0 = arith.constant 0 : i32
    %c0_i32_1 = arith.constant 0 : i32
    return %c0_i32, %c0_i32_0 : i32, i32
  }
  func.func @transform_3(%arg0: i32) -> (i32, i32) {
    %c0_i32 = arith.constant 0 : i32
    %c0_i32_0 = arith.constant 0 : i32
    %c0_i32_1 = arith.constant 0 : i32
    return %c0_i32, %c0_i32_0 : i32, i32
  }
  func.func @transform_4(%arg0: i32) -> (i32, i32) {
    %c0_i32 = arith.constant 0 : i32
    %c0_i32_0 = arith.constant 0 : i32
    %c0_i32_1 = arith.constant 0 : i32
    return %c0_i32, %c0_i32_0 : i32, i32
  }
  func.func @transform_5(%arg0: i32) -> (i32, i32) {
    %c0_i32 = arith.constant 0 : i32
    %c0_i32_0 = arith.constant 0 : i32
    %c0_i32_1 = arith.constant 0 : i32
    return %c0_i32, %c0_i32_0 : i32, i32
  }
  func.func @transform_6(%arg0: i32) -> (i32, i32) {
    %c0_i32 = arith.constant 0 : i32
    %c0_i32_0 = arith.constant 0 : i32
    %c0_i32_1 = arith.constant 0 : i32
    return %c0_i32, %c0_i32_0 : i32, i32
  }
  func.func @transform_7(%arg0: i32) -> (i32, i32) {
    %c0_i32 = arith.constant 0 : i32
    %c0_i32_0 = arith.constant 0 : i32
    %c0_i32_1 = arith.constant 0 : i32
    return %c0_i32, %c0_i32_0 : i32, i32
  }
  func.func @transform_8(%arg0: i32) -> (i32, i32) {
    %c0_i32 = arith.constant 0 : i32
    %c0_i32_0 = arith.constant 0 : i32
    %c0_i32_1 = arith.constant 0 : i32
    return %c0_i32, %c0_i32_0 : i32, i32
  }
  func.func @transform_9(%arg0: i32) -> (i32, i32) {
    %c0_i32 = arith.constant 0 : i32
    %c0_i32_0 = arith.constant 0 : i32
    %c0_i32_1 = arith.constant 0 : i32
    return %c0_i32, %c0_i32_0 : i32, i32
  }
  func.func @transform_10(%arg0: i32) -> (i32, i32) {
    %c0_i32 = arith.constant 0 : i32
    %c0_i32_0 = arith.constant 0 : i32
    %c0_i32_1 = arith.constant 0 : i32
    return %c0_i32, %c0_i32_0 : i32, i32
  }
  func.func @transform_11(%arg0: i32) -> (i32, i32) {
    %c0_i32 = arith.constant 0 : i32
    %c0_i32_0 = arith.constant 0 : i32
    %c0_i32_1 = arith.constant 0 : i32
    return %c0_i32, %c0_i32_0 : i32, i32
  }
  func.func @transform_12(%arg0: i32) -> (i32, i32) {
    %c0_i32 = arith.constant 0 : i32
    %c0_i32_0 = arith.constant 0 : i32
    %c0_i32_1 = arith.constant 0 : i32
    return %c0_i32, %c0_i32_0 : i32, i32
  }
  func.func @transform_13(%arg0: i32) -> (i32, i32) {
    %c0_i32 = arith.constant 0 : i32
    %c0_i32_0 = arith.constant 0 : i32
    %c0_i32_1 = arith.constant 0 : i32
    return %c0_i32, %c0_i32_0 : i32, i32
  }
  func.func @transform_14(%arg0: i32) -> (i32, i32) {
    %c0_i32 = arith.constant 0 : i32
    %c0_i32_0 = arith.constant 0 : i32
    %c0_i32_1 = arith.constant 0 : i32
    return %c0_i32, %c0_i32_0 : i32, i32
  }
  func.func @transform_15(%arg0: i32) -> (i32, i32) {
    %c0_i32 = arith.constant 0 : i32
    %c0_i32_0 = arith.constant 0 : i32
    %c0_i32_1 = arith.constant 0 : i32
    return %c0_i32, %c0_i32_0 : i32, i32
  }
  func.func @transform_16(%arg0: i32) -> (i32, i32) {
    %c0_i32 = arith.constant 0 : i32
    %c0_i32_0 = arith.constant 0 : i32
    %c0_i32_1 = arith.constant 0 : i32
    return %c0_i32, %c0_i32_0 : i32, i32
  }
  func.func @transform_17(%arg0: i32) -> (i32, i32) {
    %c0_i32 = arith.constant 0 : i32
    %c0_i32_0 = arith.constant 0 : i32
    return %arg0, %c0_i32 : i32, i32
  }
}

</mosaic_0001>

<bundles_post_ra>
// kernel: tpu_custom_call.1
= control target key start
LH: loop header
LB: loop body
LE: loop exit
PB: predicated region body
PF: predicated region fallthrough
CT: control target
= control target key end

     0   :  { %s3726_s0 = inlined_call_operand.hbm [shape: f32[16,128], index: 0, kind: input, shape index: {}]   ;;  %s3727_s1 = inlined_call_operand.hbm [shape: f32[16,128], index: 1, kind: input, shape index: {}]   ;;  %s3728_s2 = inlined_call_operand.hbm [shape: f32[128,256], index: 2, kind: input, shape index: {}]   ;;  %s3729_s3 = inlined_call_operand.vmem [shape: f32[1,256], index: 3, kind: input, shape index: {}]   ;;  %s3730_s4 = inlined_call_operand.hbm [shape: f32[128,256], index: 4, kind: input, shape index: {}]   ;;  %s3731_s5 = inlined_call_operand.vmem [shape: f32[1,256], index: 5, kind: input, shape index: {}]   ;;  %s3732_s6 = inlined_call_operand.hbm [shape: f32[256,256], index: 6, kind: input, shape index: {}]   ;;  %s3733_s7 = inlined_call_operand.hbm [shape: f32[256,256], index: 7, kind: input, shape index: {}]   ;;  %s3734_s8 = inlined_call_operand.vmem [shape: f32[1,256], index: 8, kind: input, shape index: {}]   ;;  %s3735_s9 = inlined_call_operand.hbm [shape: f32[256,128], index: 9, kind: input, shape index: {}]   ;;  %s3736_s10 = inlined_call_operand.vmem [shape: f32[1,128], index: 10, kind: input, shape index: {}]   ;;  %s3737_s11 = inlined_call_operand.hbm [shape: f32[256,128], index: 11, kind: input, shape index: {}]   ;;  %s3738_s12 = inlined_call_operand.vmem [shape: f32[1,128], index: 12, kind: input, shape index: {}]   ;;  %s3739_s13 = inlined_call_operand.hbm [shape: f32[256,128], index: 13, kind: input, shape index: {}]   ;;  %s3740_s14 = inlined_call_operand.vmem [shape: f32[1,128], index: 14, kind: input, shape index: {}]   ;;  %s3741_s15 = inlined_call_operand.hbm [shape: f32[128,128], index: 15, kind: input, shape index: {}]   ;;  %s3742_s16 = inlined_call_operand.hbm [shape: f32[128,128], index: 16, kind: input, shape index: {}]   ;;  %s3743_s17 = inlined_call_operand.hbm [shape: f32[16,128], index: 17, kind: output, shape index: {}]  }
   0x1   :  { %3753 = sst [smem:[#allocation29_spill]] %s3726_s0 }
   0x2   :  { %3754 = sst [smem:[#allocation30_spill]] %s3727_s1 }
   0x3   :  { %3755 = sst [smem:[#allocation31_spill]] %s3728_s2 }
   0x4   :  { %3756 = sst [smem:[#allocation32_spill]] %s3729_s3 }
   0x5   :  { %3757 = sst [smem:[#allocation33_spill]] %s3730_s4 }
   0x6   :  { %3758 = sst [smem:[#allocation34_spill]] %s3731_s5 }
   0x7   :  { %3759 = sst [smem:[#allocation35_spill]] %s3732_s6 }
   0x8   :  { %3760 = sst [smem:[#allocation36_spill]] %s3733_s7 }
   0x9   :  { %3761 = sst [smem:[#allocation37_spill]] %s3734_s8 }
   0xa   :  { %3762 = sst [smem:[#allocation38_spill]] %s3735_s9 }
   0xb   :  { %3763 = sst [smem:[#allocation39_spill]] %s3736_s10 }
   0xc   :  { %3764 = sst [smem:[#allocation40_spill]] %s3737_s11 }
   0xd   :  { %3765 = sst [smem:[#allocation41_spill]] %s3738_s12 }
   0xe   :  { %3766 = sst [smem:[#allocation42_spill]] %s3739_s13 }
   0xf   :  { %3767 = sst [smem:[#allocation43_spill]] %s3740_s14 }
  0x10   :  { %3768 = sst [smem:[#allocation44_spill]] %s3743_s17 }
  0x11   :  { %22 = vsyncpa [#allocation3], 0 }
  0x12   :  { %24 = vsyncpa [#allocation3 + $0x1], 0 }
  0x13   :  { %25 = vsyncpa [#allocation6], 0 }
  0x14   :  { %27 = vsyncpa [#allocation6 + $0x1], 0 }
  0x15   :  { %28 = vsyncpa [#allocation9], 0 }
  0x16   :  { %29 = vsyncpa [#allocation12], 0 }
  0x17   :  { %30 = vsyncpa [#allocation15], 0 }
  0x18   :  { %31 = vsyncpa [#allocation18], 0 }
  0x19   :  { %32 = vsyncpa [#allocation4], 0 }
  0x1a   :  { %34 = vsyncpa [#allocation4 + $0x1], 0  ;;  %s3213_s24 = smov 0   ;;  %s3215_s25 = smov 0  }
  0x1b   :  { %s3217_s26 = smov 0   ;;  %s3219_s27 = smov 0  }
  0x1c LB: > { %s3104_s28 = smov [#allocation7]   ;;  %s3234_s0 = sadd.s32 4294967295, %s3102_s27   ;;  %s3102_s27 = sphi %s3219_s27, %s3813_s27   ;;  %s3098_s26 = sphi %s3217_s26, %s3812_s26   ;;  %s3094_s25 = sphi %s3215_s25, %s3811_s25   ;;  %s3090_s24 = sphi %s3213_s24, %s3810_s24  }
  0x1d   : > { %s450_s29 = sshll.u32 %s3104_s28, 4  ;;  %p1966_p0 = scmp.ge.s32.totalorder %s3102_s27, 1  ;;  %s3239_s29 = int_to_ptr.vmem [resolvable:$true] %s450_s29 }
  0x1e   : > { %p3747_p1 = scmp.eq.s32.totalorder %s3234_s0, 0  ;;  %p438_p2 = scmp.lt.s32.totalorder %s3102_s27, 3 }
  0x1f   : > { %s3105_s18 = smov [#allocation8]   ;;  %s3106_s20 = smov [#allocation11]  }
  0x20   : > { %p3241_p3 = pnand %p1966_p0, %p438_p2  ;;  %s466_s19 = sshll.u32 %s3105_s18, 4  ;;  %s3254_s19 = int_to_ptr.vmem [resolvable:$true] %s466_s19 }
  0x21   : > { %s495_s21 = sshll.u32 %s3106_s20, 4  ;;  %s3771_s2 = sld [smem:[#allocation31_spill]]  ;;  %s3256_s21 = int_to_ptr.vmem [resolvable:$true] %s495_s21 }
  0x22   : > { %s3769_s30 = scalar_select %p3241_p3, 1, 0 }
  0x23   : > { %p2590_p5 = pneg %p3241_p3 }
  0x25   : > { %p3250_p6 = pnand %p2590_p5, %p3747_p1 }
  0x27   : > { %s2700_s28 = scalar_lea.hbm %s3771_s2, 4096  ;;  %p3266_p8 = pneg %p3250_p6 }
  0x28   : > { %p2701_p7 = scmp.ne.s32.totalorder %s3771_s2, %s2700_s28  ;;  %p2707_p11 = scmp.lt.u32.totalorder %s2700_s28, %s3771_s2 }
  0x2a   : > { %p2703_p9 = pnand %p3266_p8, %p2701_p7 }
  0x2c   : > { %p2704_p10 = pneg %p2703_p9 }
  0x2e   : > { %p2709_p12 = pnand %p2707_p11, %p2704_p10 }
  0x30   : > { %2712 = shalt.err (!%p2709_p12)
}
  0x31   : > { %s2713_s10 = scalar_lea.vmem %s3239_s29, 4096  ;;  %p2721_p5 = scmp.lt.s32.totalorder %s3239_s29, %s3239_s29 }
  0x32   : > { %p2714_p13 = scmp.ne.s32.totalorder %s3239_s29, %s2713_s10  ;;  %p2722_p4 = scmp.lt.s32.totalorder %s2713_s10, %s2713_s10 }
  0x34   : > { %p2716_p0 = pnand %p2714_p13, %p3266_p8  ;;  %p2723_p7 = por %p2722_p4, %p2721_p5 }
  0x36   : > { %p2717_p2 = pneg %p2716_p0 }
  0x38   : > { %p2724_p9 = pnand %p2723_p7, %p2717_p2 }
  0x3a   : > { %2727 = shalt.err (!%p2724_p9)
}
  0x3b   : > { %s3749_s17 = smov 256   ;;  %s3750_s14 = smov 16  }
  0x3c   : > { %2593 = dma.hbm_to_vmem [thread:$0]  (!%p3250_p6), %s3771_s2, 4096, %s3239_s29, [#allocation6], %s3749_s17, %s3749_s17, %s3750_s14  }
  0x3d   : > { %s3773_s4 = sld [smem:[#allocation33_spill]] }
  0x43   : > { %s2728_s10 = scalar_lea.hbm %s3773_s4, 4096 }
  0x44   : > { %p2729_p4 = scmp.ne.s32.totalorder %s3773_s4, %s2728_s10  ;;  %p2735_p12 = scmp.lt.u32.totalorder %s2728_s10, %s3773_s4 }
  0x46   : > { %p2731_p10 = pnand %p2729_p4, %p3266_p8 }
  0x48   : > { %p2732_p11 = pneg %p2731_p10 }
  0x4a   : > { %p2737_p13 = pnand %p2735_p12, %p2732_p11 }
  0x4c   : > { %2740 = shalt.err (!%p2737_p13)
}
  0x4d   : > { %s2741_s29 = scalar_lea.vmem %s3254_s19, 4096  ;;  %p2749_p7 = scmp.lt.s32.totalorder %s3254_s19, %s3254_s19 }
  0x4e   : > { %p2742_p0 = scmp.ne.s32.totalorder %s3254_s19, %s2741_s29  ;;  %p2750_p9 = scmp.lt.s32.totalorder %s2741_s29, %s2741_s29 }
  0x50   : > { %p2744_p2 = pnand %p2742_p0, %p3266_p8  ;;  %p2751_p4 = por %p2750_p9, %p2749_p7 }
  0x52   : > { %p2745_p5 = pneg %p2744_p2 }
  0x54   : > { %p2752_p10 = pnand %p2751_p4, %p2745_p5 }
  0x56   : > { %2755 = shalt.err (!%p2752_p10)
}
  0x57   : > { %2596 = dma.hbm_to_vmem [thread:$0]  (!%p3250_p6), %s3773_s4, 4096, %s3254_s19, [#allocation9], %s3749_s17, %s3749_s17, %s3750_s14  }
  0x58   : > { %s3774_s7 = sld [smem:[#allocation36_spill]] }
  0x5e   : > { %s2756_s22 = scalar_lea.hbm %s3774_s7, 8192 }
  0x5f   : > { %p2757_p11 = scmp.ne.s32.totalorder %s3774_s7, %s2756_s22  ;;  %p2763_p0 = scmp.lt.u32.totalorder %s2756_s22, %s3774_s7 }
  0x61   : > { %p2759_p12 = pnand %p2757_p11, %p3266_p8 }
  0x63   : > { %p2760_p13 = pneg %p2759_p12 }
  0x65   : > { %p2765_p2 = pnand %p2763_p0, %p2760_p13 }
  0x67   : > { %2768 = shalt.err (!%p2765_p2)
}
  0x68   : > { %s2769_s19 = scalar_lea.vmem %s3256_s21, 8192  ;;  %p2777_p4 = scmp.lt.s32.totalorder %s3256_s21, %s3256_s21 }
  0x69   : > { %p2770_p5 = scmp.ne.s32.totalorder %s3256_s21, %s2769_s19  ;;  %p2778_p10 = scmp.lt.s32.totalorder %s2769_s19, %s2769_s19 }
  0x6b   : > { %p2772_p7 = pnand %p2770_p5, %p3266_p8  ;;  %p2779_p11 = por %p2778_p10, %p2777_p4 }
  0x6d   : > { %p2773_p9 = pneg %p2772_p7 }
  0x6f   : > { %p2780_p12 = pnand %p2779_p11, %p2773_p9 }
  0x71   : > { %2783 = shalt.err (!%p2780_p12)
}
  0x72   : > { %2602 = dma.hbm_to_vmem [thread:$0]  (!%p3250_p6), %s3774_s7, 8192, %s3256_s21, [#allocation12], %s3749_s17, %s3749_s17, %s3750_s14  }
  0x73   : > { %s3109_s5 = smov [#allocation14]   ;;  %s3110_s12 = smov [#allocation17]  }
  0x74   : > { %s527_s8 = sshll.u32 %s3109_s5, 4  ;;  %s559_s22 = sshll.u32 %s3110_s12, 4  ;;  %s528_s8 = int_to_ptr.vmem [resolvable:$true] %s527_s8  ;;  %s560_s22 = int_to_ptr.vmem [resolvable:$true] %s559_s22 }
  0x75   : > { %s3775_s11 = sld [smem:[#allocation40_spill]] }
  0x7b   : > { %s2784_s20 = scalar_lea.hbm %s3775_s11, 4096 }
  0x7c   : > { %p2785_p13 = scmp.ne.s32.totalorder %s3775_s11, %s2784_s20  ;;  %p2791_p5 = scmp.lt.u32.totalorder %s2784_s20, %s3775_s11 }
  0x7e   : > { %p2787_p0 = pnand %p2785_p13, %p3266_p8 }
  0x80   : > { %p2788_p2 = pneg %p2787_p0 }
  0x82   : > { %p2793_p7 = pnand %p2791_p5, %p2788_p2 }
  0x84   : > { %2796 = shalt.err (!%p2793_p7)
}
  0x85   : > { %s2797_s21 = scalar_lea.vmem %s528_s8, 4096  ;;  %p2805_p11 = scmp.lt.s32.totalorder %s528_s8, %s528_s8 }
  0x86   : > { %p2798_p9 = scmp.ne.s32.totalorder %s528_s8, %s2797_s21  ;;  %p2806_p12 = scmp.lt.s32.totalorder %s2797_s21, %s2797_s21 }
  0x88   : > { %p2800_p4 = pnand %p2798_p9, %p3266_p8  ;;  %p2807_p1 = por %p2806_p12, %p2805_p11 }
  0x8a   : > { %p2801_p10 = pneg %p2800_p4 }
  0x8c   : > { %p2808_p3 = pnand %p2807_p1, %p2801_p10 }
  0x8e   : > { %2811 = shalt.err (!%p2808_p3)
}
  0x8f   : > { %s3111_s3 = smov 128   ;;  %s3112_s5 = smov 8  }
  0x90   : > { %2608 = dma.hbm_to_vmem [thread:$0]  (!%p3250_p6), %s3775_s11, 4096, %s528_s8, [#allocation15], %s3111_s3, %s3111_s3, %s3112_s5  }
  0x91   : > { %s2812_s20 = scalar_lea.hbm %s3741_s15, 2048 }
  0x92   : > { %p2813_p1 = scmp.ne.s32.totalorder %s3741_s15, %s2812_s20  ;;  %p2819_p0 = scmp.lt.u32.totalorder %s2812_s20, %s3741_s15 }
  0x94   : > { %p2815_p3 = pnand %p2813_p1, %p3266_p8 }
  0x96   : > { %p2816_p13 = pneg %p2815_p3 }
  0x98   : > { %p2821_p2 = pnand %p2819_p0, %p2816_p13 }
  0x9a   : > { %2824 = shalt.err (!%p2821_p2)
}
  0x9b   : > { %s2825_s2 = scalar_lea.vmem %s560_s22, 2048  ;;  %p2833_p4 = scmp.lt.s32.totalorder %s560_s22, %s560_s22 }
  0x9c   : > { %p2826_p5 = scmp.ne.s32.totalorder %s560_s22, %s2825_s2  ;;  %p2834_p10 = scmp.lt.s32.totalorder %s2825_s2, %s2825_s2 }
  0x9e   : > { %p2828_p7 = pnand %p2826_p5, %p3266_p8  ;;  %p2835_p11 = por %p2834_p10, %p2833_p4 }
  0xa0   : > { %p2829_p9 = pneg %p2828_p7 }
  0xa2   : > { %p2836_p12 = pnand %p2835_p11, %p2829_p9 }
  0xa4   : > { %2839 = shalt.err (!%p2836_p12)
}
  0xa5   : > { %2614 = dma.hbm_to_vmem [thread:$0]  (!%p3250_p6), %s3741_s15, 2048, %s560_s22, [#allocation18], %s3111_s3, %s3111_s3, %s3112_s5  }
  0xa6   : > { %s3113_s23 = smov [#allocation10]   ;;  %s3114_s20 = smov [#allocation13]  }
  0xa7   : > { %s482_s28 = sshll.u32 %s3113_s23, 4  ;;  %s511_s10 = sshll.u32 %s3114_s20, 4  ;;  %s483_s28 = int_to_ptr.vmem [resolvable:$true] %s482_s28  ;;  %s512_s10 = int_to_ptr.vmem [resolvable:$true] %s511_s10 }
  0xa8   : > { %s3776_s6 = sld [smem:[#allocation35_spill]] }
  0xae   : > { %s2840_s21 = scalar_lea.hbm %s3776_s6, 8192 }
  0xaf   : > { %p2841_p1 = scmp.ne.s32.totalorder %s3776_s6, %s2840_s21  ;;  %p2847_p0 = scmp.lt.u32.totalorder %s2840_s21, %s3776_s6 }
  0xb1   : > { %p2843_p3 = pnand %p2841_p1, %p3266_p8 }
  0xb3   : > { %p2844_p13 = pneg %p2843_p3 }
  0xb5   : > { %p2849_p2 = pnand %p2847_p0, %p2844_p13 }
  0xb7   : > { %2852 = shalt.err (!%p2849_p2)
}
  0xb8   : > { %s2853_s22 = scalar_lea.vmem %s483_s28, 8192  ;;  %p2861_p4 = scmp.lt.s32.totalorder %s483_s28, %s483_s28 }
  0xb9   : > { %p2854_p5 = scmp.ne.s32.totalorder %s483_s28, %s2853_s22  ;;  %p2862_p10 = scmp.lt.s32.totalorder %s2853_s22, %s2853_s22 }
  0xbb   : > { %p2856_p7 = pnand %p2854_p5, %p3266_p8  ;;  %p2863_p11 = por %p2862_p10, %p2861_p4 }
  0xbd   : > { %p2857_p9 = pneg %p2856_p7 }
  0xbf   : > { %p2864_p12 = pnand %p2863_p11, %p2857_p9 }
  0xc1   : > { %2867 = shalt.err (!%p2864_p12)
}
  0xc2   : > { %s3777_s17 = smov 16   ;;  %s3778_s12 = smov 256  }
  0xc3   : > { %2599 = dma.hbm_to_vmem [thread:$0]  (!%p3250_p6), %s3776_s6, 8192, %s483_s28, [#allocation9], %s3778_s12, %s3778_s12, %s3777_s17  }
  0xc4   : > { %s3779_s9 = sld [smem:[#allocation38_spill]] }
  0xca   : > { %s2868_s29 = scalar_lea.hbm %s3779_s9, 4096 }
  0xcb   : > { %p2869_p1 = scmp.ne.s32.totalorder %s3779_s9, %s2868_s29  ;;  %p2875_p0 = scmp.lt.u32.totalorder %s2868_s29, %s3779_s9 }
  0xcd   : > { %p2871_p3 = pnand %p2869_p1, %p3266_p8 }
  0xcf   : > { %p2872_p13 = pneg %p2871_p3 }
  0xd1   : > { %p2877_p2 = pnand %p2875_p0, %p2872_p13 }
  0xd3   : > { %2880 = shalt.err (!%p2877_p2)
}
  0xd4   : > { %s2881_s14 = scalar_lea.vmem %s512_s10, 4096  ;;  %p2889_p4 = scmp.lt.s32.totalorder %s512_s10, %s512_s10 }
  0xd5   : > { %p2882_p5 = scmp.ne.s32.totalorder %s512_s10, %s2881_s14  ;;  %p2890_p10 = scmp.lt.s32.totalorder %s2881_s14, %s2881_s14 }
  0xd7   : > { %p2884_p7 = pnand %p2882_p5, %p3266_p8  ;;  %p2891_p11 = por %p2890_p10, %p2889_p4 }
  0xd9   : > { %p2885_p9 = pneg %p2884_p7 }
  0xdb   : > { %p2892_p12 = pnand %p2891_p11, %p2885_p9 }
  0xdd   : > { %2895 = shalt.err (!%p2892_p12)
}
  0xde   : > { %2605 = dma.hbm_to_vmem [thread:$0]  (!%p3250_p6), %s3779_s9, 4096, %s512_s10, [#allocation12], %s3111_s3, %s3111_s3, %s3112_s5  }
  0xdf   : > { %s3115_s12 = smov [#allocation16]   ;;  %s3116_s20 = smov [#allocation19]  }
  0xe0   : > { %s543_s23 = sshll.u32 %s3115_s12, 4  ;;  %s572_s19 = sshll.u32 %s3116_s20, 4  ;;  %s544_s23 = int_to_ptr.vmem [resolvable:$true] %s543_s23  ;;  %s573_s19 = int_to_ptr.vmem [resolvable:$true] %s572_s19 }
  0xe1   : > { %s3780_s13 = sld [smem:[#allocation42_spill]] }
  0xe7   : > { %s2896_s2 = scalar_lea.hbm %s3780_s13, 4096 }
  0xe8   : > { %p2897_p1 = scmp.ne.s32.totalorder %s3780_s13, %s2896_s2  ;;  %p2903_p0 = scmp.lt.u32.totalorder %s2896_s2, %s3780_s13 }
  0xea   : > { %p2899_p3 = pnand %p2897_p1, %p3266_p8 }
  0xec   : > { %p2900_p13 = pneg %p2899_p3 }
  0xee   : > { %p2905_p2 = pnand %p2903_p0, %p2900_p13 }
  0xf0   : > { %2908 = shalt.err (!%p2905_p2)
}
  0xf1   : > { %s2909_s10 = scalar_lea.vmem %s544_s23, 4096  ;;  %p2917_p4 = scmp.lt.s32.totalorder %s544_s23, %s544_s23 }
  0xf2   : > { %p2910_p5 = scmp.ne.s32.totalorder %s544_s23, %s2909_s10  ;;  %p2918_p10 = scmp.lt.s32.totalorder %s2909_s10, %s2909_s10 }
  0xf4   : > { %p2912_p7 = pnand %p2910_p5, %p3266_p8  ;;  %p2919_p11 = por %p2918_p10, %p2917_p4 }
  0xf6   : > { %p2913_p9 = pneg %p2912_p7 }
  0xf8   : > { %p2920_p12 = pnand %p2919_p11, %p2913_p9 }
  0xfa   : > { %2923 = shalt.err (!%p2920_p12)
}
  0xfb   : > { %2611 = dma.hbm_to_vmem [thread:$0]  (!%p3250_p6), %s3780_s13, 4096, %s544_s23, [#allocation15], %s3111_s3, %s3111_s3, %s3112_s5  }
  0xfc   : > { %s2924_s21 = scalar_lea.hbm %s3742_s16, 2048 }
  0xfd   : > { %p2925_p1 = scmp.ne.s32.totalorder %s3742_s16, %s2924_s21  ;;  %p2931_p0 = scmp.lt.u32.totalorder %s2924_s21, %s3742_s16 }
  0xff   : > { %p2927_p3 = pnand %p2925_p1, %p3266_p8 }
 0x101   : > { %p2928_p13 = pneg %p2927_p3 }
 0x103   : > { %p2933_p2 = pnand %p2931_p0, %p2928_p13 }
 0x105   : > { %2936 = shalt.err (!%p2933_p2)
}
 0x106   : > { %s2937_s28 = scalar_lea.vmem %s573_s19, 2048  ;;  %p2945_p4 = scmp.lt.s32.totalorder %s573_s19, %s573_s19 }
 0x107   : > { %p2938_p5 = scmp.ne.s32.totalorder %s573_s19, %s2937_s28  ;;  %p2946_p10 = scmp.lt.s32.totalorder %s2937_s28, %s2937_s28 }
 0x109   : > { %p2940_p7 = pnand %p2938_p5, %p3266_p8  ;;  %p2947_p11 = por %p2946_p10, %p2945_p4 }
 0x10b   : > { %p2941_p9 = pneg %p2940_p7 }
 0x10d   : > { %p2948_p12 = pnand %p2947_p11, %p2941_p9 }
 0x10f   : > { %2951 = shalt.err (!%p2948_p12)
}
 0x110   : > { %2617 = dma.hbm_to_vmem [thread:$0]  (!%p3250_p6), %s3742_s16, 2048, %s573_s19, [#allocation18], %s3111_s3, %s3111_s3, %s3112_s5  }
 0x111   : > { %s1965_s1 = sadd.s32 4294967294, %s3102_s27   ;;  %s3470_s18 = sadd.s32 1, %s3102_s27  }
 0x112   : > { %s47_s17 = sadd.s32 1, %s3098_s26  ;;  %s44_s12 = ssub.s32 %s3102_s27, %s3470_s18 }
 0x113   : > { %p54_p8 = scmp.ne.s32.totalorder %s3098_s26, %s3094_s25  ;;  %p45_p1 = scmp.eq.s32.totalorder %s44_s12, 0 }
 0x114   : > { %p55_p3 = scmp.eq.s32.totalorder %s3102_s27, 0  ;;  %p60_p13 = scmp.ne.s32.totalorder %s3094_s25, %s3090_s24 }
 0x115   : > { %p425_p0 = scmp.eq.s32.totalorder %s3234_s0, 1  ;;  %p3781_p5 = scmp.eq.s32.totalorder %s3234_s0, 0 }
 0x116   : > { %s3482_s20 = scalar_select %p45_p1, %s3098_s26, %s47_s17  }
 0x117   : > { %p56_p2 = por %p55_p3, %p54_p8  ;;  %p3486_p7 = por %p3781_p5, %p60_p13 }
 0x118   : > { %p3490_p6 = por %p425_p0, %p54_p8  ;;  %p431_p9 = scmp.eq.s32.totalorder %s1965_s1, 1 }
 0x119   : > { %s3782_s29 = scalar_select %p3486_p7, 1, 0 }
 0x11a   : > { %s3783_s3 = scalar_select %p3490_p6, 1, 0 }
 0x11b   : > { %p2638_p4 = scmp.lt.s32.totalorder %s3102_s27, 2  ;;  %s586_s5 = sand.u32 1, %s3098_s26  }
 0x11c   : > { %p3496_p10 = por %p431_p9, %p60_p13  ;;  %s3500_s21 = sshll.u32 %s586_s5, 3 }
 0x11d   : > { %s1978_s2 = sshll.u32 %s3102_s27, 7  ;;  %s3785_s14 = sld [smem:[#allocation29_spill]] }
 0x11e   : > { %s3784_s19 = scalar_select %p3496_p10, 1, 0 }
 0x11f   : > { %s590_s23 = scalar_lea.vmem [#allocation2], %s3500_s21  ;;  %p3509_p11 = pnand %p2638_p4, %p56_p2 }
 0x120   : > { %s597_s10 = sshll.u32 %s590_s23, 4  ;;  %s3787_s4 = sld [smem:[#allocation30_spill]]  ;;  %s3513_s10 = int_to_ptr.vmem [resolvable:$true] %s597_s10 }
 0x121   : > { %s587_s22 = scalar_lea.sflag [#allocation3], %s586_s5  ;;  %p2954_p8 = pneg %p3509_p11 }
 0x123   : > { %s3506_s28 = scalar_lea.hbm %s3785_s14, %s1978_s2  ;;  %s2957_s9 = scalar_lea.hbm %s3785_s14, 256 }
 0x124   : > { %s2952_s6 = scalar_lea.hbm %s3506_s28, 128  ;;  %p2958_p13 = scmp.lt.u32.totalorder %s3506_s28, %s3785_s14 }
 0x125   : > { %p2953_p12 = scmp.ne.s32.totalorder %s3506_s28, %s2952_s6  ;;  %p2959_p0 = scmp.lt.u32.totalorder %s2957_s9, %s2952_s6 }
 0x126   : > { %s3518_s8 = scalar_lea.hbm %s3787_s4, %s1978_s2  ;;  %p2961_p5 = scmp.lt.u32.totalorder %s2952_s6, %s3506_s28 }
 0x127   : > { %p2955_p1 = pnand %p2954_p8, %p2953_p12  ;;  %p2960_p2 = por %p2959_p0, %p2958_p13 }
 0x129   : > { %p2956_p3 = pneg %p2955_p1  ;;  %p2962_p9 = por %p2961_p5, %p2960_p2 }
 0x12b   : > { %p2963_p4 = pnand %p2962_p9, %p2956_p3 }
 0x12d   : > { %2966 = shalt.err (!%p2963_p4)
}
 0x12e   : > { %s2967_s5 = scalar_lea.vmem %s3513_s10, 128  ;;  %s3117_s7 = smov [#allocation2]  }
 0x12f   : > { %p2968_p12 = scmp.ne.s32.totalorder %s3513_s10, %s2967_s5  ;;  %s2972_s2 = sshll.u32 %s3117_s7, 4  ;;  %s2973_s2 = int_to_ptr.vmem [resolvable:$false] %s2972_s2 }
 0x130   : > { %s2974_s11 = scalar_lea.vmem %s2973_s2, 256  ;;  %p2975_p6 = scmp.lt.s32.totalorder %s3513_s10, %s2973_s2 }
 0x131   : > { %p2970_p1 = pnand %p2968_p12, %p2954_p8  ;;  %p2976_p13 = scmp.lt.s32.totalorder %s2974_s11, %s2967_s5 }
 0x133   : > { %p2971_p10 = pneg %p2970_p1  ;;  %p2977_p0 = por %p2976_p13, %p2975_p6 }
 0x135   : > { %p2978_p2 = pnand %p2977_p0, %p2971_p10 }
 0x137   : > { %2981 = shalt.err (!%p2978_p2)
}
 0x138   : > { %2621 = dma.hbm_to_vmem [thread:$0]  (!%p3509_p11), %s3506_s28, 128, %s3513_s10, %s587_s22  }
 0x139   : > { %s604_s6 = sand.u32 1, %s3102_s27   ;;  %s608_s9 = scalar_lea.vmem [#allocation5], %s3500_s21 }
 0x13a   : > { %s615_s13 = sshll.u32 %s608_s9, 4  ;;  %s605_s17 = scalar_lea.sflag [#allocation6], %s604_s6  ;;  %s616_s13 = int_to_ptr.vmem [resolvable:$true] %s615_s13 }
 0x13b   : > { %s2982_s12 = scalar_lea.hbm %s3518_s8, 128  ;;  %s2987_s7 = scalar_lea.hbm %s3787_s4, 256 }
 0x13c   : > { %p2983_p6 = scmp.ne.s32.totalorder %s3518_s8, %s2982_s12  ;;  %p2988_p5 = scmp.lt.u32.totalorder %s3518_s8, %s3787_s4 }
 0x13d   : > { %p2989_p9 = scmp.lt.u32.totalorder %s2987_s7, %s2982_s12  ;;  %p2991_p12 = scmp.lt.u32.totalorder %s2982_s12, %s3518_s8 }
 0x13e   : > { %p2985_p10 = pnand %p2983_p6, %p2954_p8 }
 0x13f   : > { %p2990_p4 = por %p2989_p9, %p2988_p5 }
 0x140   : > { %p2986_p3 = pneg %p2985_p10 }
 0x141   : > { %p2992_p1 = por %p2991_p12, %p2990_p4 }
 0x143   : > { %p2993_p13 = pnand %p2992_p1, %p2986_p3 }
 0x145   : > { %2996 = shalt.err (!%p2993_p13)
}
 0x146   : > { %s2997_s21 = scalar_lea.vmem %s616_s13, 128  ;;  %s3118_s28 = smov [#allocation5]  }
 0x147   : > { %p2998_p0 = scmp.ne.s32.totalorder %s616_s13, %s2997_s21  ;;  %s3002_s10 = sshll.u32 %s3118_s28, 4  ;;  %s3003_s10 = int_to_ptr.vmem [resolvable:$false] %s3002_s10 }
 0x148   : > { %s3004_s22 = scalar_lea.vmem %s3003_s10, 256  ;;  %p3005_p10 = scmp.lt.s32.totalorder %s616_s13, %s3003_s10 }
 0x149   : > { %p3000_p2 = pnand %p2998_p0, %p2954_p8  ;;  %p3006_p7 = scmp.lt.s32.totalorder %s3004_s22, %s2997_s21 }
 0x14b   : > { %p3001_p6 = pneg %p3000_p2  ;;  %p3007_p5 = por %p3006_p7, %p3005_p10 }
 0x14d   : > { %p3008_p9 = pnand %p3007_p5, %p3001_p6 }
 0x14f   : > { %3011 = shalt.err (!%p3008_p9)
}
 0x150   : > { %2624 = dma.hbm_to_vmem [thread:$0]  (!%p3509_p11), %s3518_s8, 128, %s616_s13, %s605_s17  }
 0x151   : > { %p3788_p3 = scmp.ne.s32.totalorder %s3769_s30, 0 }
 0x152   : > { %s3569_s6 = sand.u32 (!%p3788_p3), 1, %s3094_s25   ;;  %p3789_p7 = scmp.ne.s32.totalorder (!%p3788_p3), %s3782_s29, 0 }
 0x153   : > { %624 = sbr.rel (%p3788_p3) target bundleno = 1753 (0x6d9), region = 88  ;;  %s3572_s9 = sshll.u32 (!%p3788_p3), %s3569_s6, 3 }
 0x154   : > { %s627_s12 = scalar_lea.sflag (!%p3788_p3), [#allocation3], %s3569_s6  ;;  %s630_s23 = scalar_lea.vmem (!%p3788_p3), [#allocation2], %s3572_s9 }
 0x15a   : > { %3057 = dma.done.wait (%p3789_p7), %s627_s12, 128  }
 0x15b   : > { %3059 = vsyncadd (%p3789_p7), %s627_s12, 4294967168  ;;  %s635_s30 = sand.u32 1, %s3234_s0   ;;  %s639_s8 = scalar_lea.vmem [#allocation5], %s3572_s9 }
 0x15c   : > { %s636_s1 = scalar_lea.sflag [#allocation6], %s635_s30 }
 0x15d   : > { %3061 = dma.done.wait (%p3789_p7), %s636_s1, 128  }
 0x15e   : > { %3063 = vsyncadd (%p3789_p7), %s636_s1, 4294967168  ;;  %p3790_p11 = scmp.eq.s32.totalorder %s3234_s0, 0 }
 0x160   : > { %3065 = dma.done.wait (%p3790_p11), [#allocation6], 4096   ;;  %p3791_p8 = pmov %p3790_p11 }
 0x162   : > { %3067 = vsyncadd (%p3791_p8), [#allocation6], 4294963200  ;;  %p3792_p4 = pmov %p3791_p8 }
 0x164   : > { %3069 = dma.done.wait (%p3792_p4), [#allocation9], 12288   ;;  %p3793_p12 = pmov %p3792_p4 }
 0x165   : > { %p3794_p1 = pmov %p3792_p4 }
 0x166   : > { %3071 = vsyncadd (%p3793_p12), [#allocation9], 4294955008 }
 0x167   : > { %3073 = dma.done.wait (%p3794_p1), [#allocation12], 12288   ;;  %p3795_p13 = pmov %p3794_p1 }
 0x168   : > { %p3796_p0 = pmov %p3794_p1 }
 0x169   : > { %3075 = vsyncadd (%p3795_p13), [#allocation12], 4294955008 }
 0x16a   : > { %3077 = dma.done.wait (%p3796_p0), [#allocation15], 8192   ;;  %p3797_p2 = pmov %p3796_p0 }
 0x16b   : > { %p3798_p6 = pmov %p3796_p0 }
 0x16c   : > { %3079 = vsyncadd (%p3797_p2), [#allocation15], 4294959104 }
 0x16d   : > { %3081 = dma.done.wait (%p3798_p6), [#allocation18], 4096   ;;  %p3799_p10 = pmov %p3796_p0 }
 0x16e   : > { %v3119_v0 = vmov 0.0   ;;  %v855_v1 = vld [vmem:[#allocation8 + $0x8] sm:$0xff]  ;;  %v857_v2 = vld [vmem:[#allocation8 + $0x18] sm:$0xff]  ;;  %v854_v3 = vld [vmem:[#allocation8] sm:$0xff]  ;;  %s3800_s17 = sld [smem:[#allocation34_spill]]  ;;  %s3801_s2 = sld [smem:[#allocation32_spill]] }
 0x16f   : > { %3083 = vsyncadd (%p3799_p10), [#allocation18], 4294963200  ;;  %962 = vmatprep.mubr.f32.mxu1 %v3119_v0  ;;  %841 = vmatprep.mubr.f32.mxu0 %v3119_v0  ;;  %v2242_v4 = vpack.c.bf16 %v857_v2, %v855_v1  ;;  %v856_v5 = vld [vmem:[#allocation8 + $0x10] sm:$0xff]  ;;  %v859_v6 = vld [vmem:[#allocation8 + $0x28] sm:$0xff]  ;;  %s3802_s28 = sld [smem:[#allocation37_spill]]  ;;  %vm3121_vm6 = vmmov 0  }
 0x170   : > { %v861_v7 = vld [vmem:[#allocation8 + $0x38] sm:$0xff]  ;;  %v2244_v8 = vpack.c.bf16 %v856_v5, %v854_v3  ;;  %v858_v10 = vld [vmem:[#allocation8 + $0x20] sm:$0xff]  ;;  %v860_v11 = vld [vmem:[#allocation8 + $0x30] sm:$0xff]  ;;  %s3803_s12 = sld [smem:[#allocation41_spill]]  ;;  %s3804_s1 = sld [smem:[#allocation43_spill]] }
 0x171   : > { %v2246_v9 = vpack.c.bf16 %v861_v7, %v859_v6  ;;  %v863_v12 = vld [vmem:[#allocation8 + $0x48] sm:$0xff]  ;;  %2243 = vmatprep.subr.bf16.mxu1 %v2242_v4  ;;  %v865_v13 = vld [vmem:[#allocation8 + $0x58] sm:$0xff]  ;;  %v2248_v14 = vpack.c.bf16 %v860_v11, %v858_v10  ;;  %v862_v16 = vld [vmem:[#allocation8 + $0x40] sm:$0xff]  ;;  %s3805_s13 = sld [smem:[#allocation39_spill]]  ;;  %s730_s5 = scalar_lea.vmem [#allocation20], %s3572_s9 }
 0x172   : > { %2245 = vmatpush1.bf16.msra.mxu1 %v2244_v8  ;;  %v2250_v15 = vpack.c.bf16 %v865_v13, %v863_v12  ;;  %v864_v17 = vld [vmem:[#allocation8 + $0x50] sm:$0xff]  ;;  %v867_v18 = vld [vmem:[#allocation8 + $0x68] sm:$0xff]  ;;  %v869_v19 = vld [vmem:[#allocation8 + $0x78] sm:$0xff]  ;;  %s1787_s7 = sshll.u32 %s730_s5, 4  ;;  %s3806_s21 = sld [smem:[#allocation44_spill]]  ;;  %s3684_s7 = int_to_ptr.vmem [resolvable:$true] %s1787_s7 }
 0x173   : > { %2247 = vmatprep.subr.bf16.mxu1 %v2246_v9  ;;  %v2252_v20 = vpack.c.bf16 %v864_v17, %v862_v16  ;;  %v2254_v21 = vpack.c.bf16 %v869_v19, %v867_v18  ;;  %v866_v22 = vld [vmem:[#allocation8 + $0x60] sm:$0xff]  ;;  %v868_v23 = vld [vmem:[#allocation8 + $0x70] sm:$0xff]  ;;  %v871_v24 = vld [vmem:[#allocation8 + $0x88] sm:$0xff]  ;;  %s1774_s10 = scalar_lea.sflag [#allocation4], %s3569_s6  ;;  %s3012_s22 = scalar_lea.vmem %s3684_s7, 128 }
 0x174   : > { %v873_v25 = vld [vmem:[#allocation8 + $0x98] sm:$0xff]  ;;  %v870_v26 = vld [vmem:[#allocation8 + $0x80] sm:$0xff]  ;;  %v872_v27 = vld [vmem:[#allocation8 + $0x90] sm:$0xff]  ;;  %v2256_v31 = vpack.c.bf16 %v868_v23, %v866_v22  ;;  %p3013_p5 = scmp.ne.s32.totalorder %s3684_s7, %s3012_s22  ;;  %p3807_p9 = scmp.ne.s32.totalorder %s3783_s3, 0 }
 0x175   : > { %v734_v28 = vld [vmem:[#allocation7 + $0x8] sm:$0xff]  ;;  %v736_v29 = vld [vmem:[#allocation7 + $0x18] sm:$0xff]  ;;  %v733_v30 = vld [vmem:[#allocation7] sm:$0xff]  ;;  %v2258_v36 = vpack.c.bf16 %v873_v25, %v871_v24  ;;  %v2260_v46 = vpack.c.bf16 %v872_v27, %v870_v26 }
 0x176   : > { %2249 = vmatpush1.bf16.msra.mxu1 %v2248_v14  ;;  %v2210_v32 = vpack.c.bf16 %v736_v29, %v734_v28  ;;  %v735_v33 = vld [vmem:[#allocation7 + $0x10] sm:$0xff]  ;;  %v738_v34 = vld [vmem:[#allocation7 + $0x28] sm:$0xff]  ;;  %v740_v35 = vld [vmem:[#allocation7 + $0x38] sm:$0xff]  ;;  %p3014_p3 = pnand %p3013_p5, %p3807_p9 }
 0x177   : > { %2251 = vmatprep.subr.bf16.mxu1 %v2250_v15  ;;  %v2212_v37 = vpack.c.bf16 %v735_v33, %v733_v30  ;;  %v2214_v38 = vpack.c.bf16 %v740_v35, %v738_v34  ;;  %v737_v39 = vld [vmem:[#allocation7 + $0x20] sm:$0xff]  ;;  %v739_v40 = vld [vmem:[#allocation7 + $0x30] sm:$0xff]  ;;  %v742_v41 = vld [vmem:[#allocation7 + $0x48] sm:$0xff] }
 0x178   : > { %v875_v42 = vld [vmem:[#allocation8 + $0xa8] sm:$0xff]  ;;  %v877_v43 = vld [vmem:[#allocation8 + $0xb8] sm:$0xff]  ;;  %2211 = vmatprep.subr.bf16.mxu0 %v2210_v32  ;;  %v2216_v45 = vpack.c.bf16 %v739_v40, %v737_v39  ;;  %v874_v47 = vld [vmem:[#allocation8 + $0xa0] sm:$0xff]  ;;  %p3015_p7 = pneg %p3014_p3 }
 0x179   : > { %v744_v44 = vld [vmem:[#allocation7 + $0x58] sm:$0xff]  ;;  %2213 = vmatpush1.bf16.msra.mxu0 %v2212_v37  ;;  %v741_v49 = vld [vmem:[#allocation7 + $0x40] sm:$0xff]  ;;  %v743_v50 = vld [vmem:[#allocation7 + $0x50] sm:$0xff]  ;;  %v2262_v51 = vpack.c.bf16 %v877_v43, %v875_v42 }
 0x17a   : > { %2253 = vmatpush1.bf16.msra.mxu1 %v2252_v20  ;;  %2215 = vmatprep.subr.bf16.mxu0 %v2214_v38  ;;  %v2218_v48 = vpack.c.bf16 %v744_v44, %v742_v41  ;;  %v876_v52 = vld [vmem:[#allocation8 + $0xb0] sm:$0xff]  ;;  %v746_v53 = vld [vmem:[#allocation7 + $0x68] sm:$0xff]  ;;  %v748_v54 = vld [vmem:[#allocation7 + $0x78] sm:$0xff]  ;;  %v2220_v57 = vpack.c.bf16 %v743_v50, %v741_v49 }
 0x17b   : > { %2255 = vmatprep.subr.bf16.mxu1 %v2254_v21  ;;  %v879_v55 = vld [vmem:[#allocation8 + $0xc8] sm:$0xff]  ;;  %v881_v56 = vld [vmem:[#allocation8 + $0xd8] sm:$0xff]  ;;  %v2264_v58 = vpack.c.bf16 %v876_v52, %v874_v47  ;;  %v878_v59 = vld [vmem:[#allocation8 + $0xc0] sm:$0xff]  ;;  %v2222_v60 = vpack.c.bf16 %v748_v54, %v746_v53 }
 0x17c   : > { %v745_v61 = vld [vmem:[#allocation7 + $0x60] sm:$0xff]  ;;  %v747_v62 = vld [vmem:[#allocation7 + $0x70] sm:$0xff]  ;;  %v2266_v63 = vpack.c.bf16 %v881_v56, %v879_v55  ;;  %v750_v2 = vld [vmem:[#allocation7 + $0x88] sm:$0xff] }
 0x17d   : > { %2217 = vmatpush1.bf16.msra.mxu0 %v2216_v45  ;;  %v880_v1 = vld [vmem:[#allocation8 + $0xd0] sm:$0xff]  ;;  %v752_v3 = vld [vmem:[#allocation7 + $0x98] sm:$0xff]  ;;  %v883_v4 = vld [vmem:[#allocation8 + $0xe8] sm:$0xff]  ;;  %v2224_v6 = vpack.c.bf16 %v747_v62, %v745_v61 }
 0x17e   : > { %2257 = vmatpush1.bf16.msra.mxu1 %v2256_v31  ;;  %2219 = vmatprep.subr.bf16.mxu0 %v2218_v48  ;;  %v885_v5 = vld [vmem:[#allocation8 + $0xf8] sm:$0xff]  ;;  %v2268_v7 = vpack.c.bf16 %v880_v1, %v878_v59  ;;  %v882_v8 = vld [vmem:[#allocation8 + $0xe0] sm:$0xff]  ;;  %v2226_v9 = vpack.c.bf16 %v752_v3, %v750_v2  ;;  %v751_v11 = vld [vmem:[#allocation7 + $0x90] sm:$0xff] }
 0x17f   : > { %2259 = vmatprep.subr.bf16.mxu1 %v2258_v36  ;;  %v749_v10 = vld [vmem:[#allocation7 + $0x80] sm:$0xff]  ;;  %v2270_v12 = vpack.c.bf16 %v885_v5, %v883_v4  ;;  %v884_v13 = vld [vmem:[#allocation8 + $0xf0] sm:$0xff]  ;;  %v754_v14 = vld [vmem:[#allocation7 + $0xa8] sm:$0xff] }
 0x180   : > { %v756_v15 = vld [vmem:[#allocation7 + $0xb8] sm:$0xff]  ;;  %v2228_v16 = vpack.c.bf16 %v751_v11, %v749_v10  ;;  %v2272_v17 = vpack.c.bf16 %v884_v13, %v882_v8  ;;  %v753_v19 = vld [vmem:[#allocation7 + $0xa0] sm:$0xff]  ;;  %v755_v20 = vld [vmem:[#allocation7 + $0xb0] sm:$0xff] }
 0x181   : > { %2221 = vmatpush1.bf16.msra.mxu0 %v2220_v57  ;;  %v2230_v18 = vpack.c.bf16 %v756_v15, %v754_v14  ;;  %v758_v21 = vld [vmem:[#allocation7 + $0xc8] sm:$0xff]  ;;  %v760_v22 = vld [vmem:[#allocation7 + $0xd8] sm:$0xff]  ;;  %v2232_v23 = vpack.c.bf16 %v755_v20, %v753_v19  ;;  %v757_v26 = vld [vmem:[#allocation7 + $0xc0] sm:$0xff] }
 0x182   : > { %2261 = vmatpush1.bf16.msra.mxu1 %v2260_v46  ;;  %2223 = vmatprep.subr.bf16.mxu0 %v2222_v60  ;;  %v732_v24 = vld [vmem:[%s639_s8] sm:$0xff]  ;;  %v2234_v25 = vpack.c.bf16 %v760_v22, %v758_v21  ;;  %v762_v28 = vld [vmem:[#allocation7 + $0xe8] sm:$0xff]  ;;  %v761_v32 = vld [vmem:[#allocation7 + $0xe0] sm:$0xff] }
 0x183   : > { %2263 = vmatprep.subr.bf16.mxu1 %v2262_v51  ;;  %v759_v27 = vld [vmem:[#allocation7 + $0xd0] sm:$0xff]  ;;  %v764_v29 = vld [vmem:[#allocation7 + $0xf8] sm:$0xff]  ;;  %v1040_v34 = vld [vmem:[#allocation11 + $0x8] sm:$0xff] }
 0x184   : > { %v2236_v30 = vpack.c.bf16 %v759_v27, %v757_v26  ;;  %v2238_v31 = vpack.c.bf16 %v764_v29, %v762_v28  ;;  %v763_v33 = vld [vmem:[#allocation7 + $0xf0] sm:$0xff]  ;;  %v1042_v35 = vld [vmem:[#allocation11 + $0x18] sm:$0xff]  ;;  %v1039_v38 = vld [vmem:[#allocation11] sm:$0xff] }
 0x185   : > { %2225 = vmatpush1.bf16.msra.mxu0 %v2224_v6  ;;  %v2240_v36 = vpack.c.bf16 %v763_v33, %v761_v32  ;;  %v2274_v37 = vpack.c.bf16 %v1042_v35, %v1040_v34  ;;  %v1041_v39 = vld [vmem:[#allocation11 + $0x10] sm:$0xff]  ;;  %v1044_v40 = vld [vmem:[#allocation11 + $0x28] sm:$0xff]  ;;  %v1046_v41 = vld [vmem:[#allocation11 + $0x38] sm:$0xff] }
 0x186   : > { %2265 = vmatpush1.bf16.msra.mxu1 %v2264_v58  ;;  %2227 = vmatprep.subr.bf16.mxu0 %v2226_v9  ;;  %v731_v42 = vld [vmem:[%s630_s23] sm:$0xff]  ;;  %v2276_v43 = vpack.c.bf16 %v1041_v39, %v1039_v38  ;;  %v2278_v44 = vpack.c.bf16 %v1046_v41, %v1044_v40  ;;  %v1045_v46 = vld [vmem:[#allocation11 + $0x30] sm:$0xff]  ;;  %v1050_v48 = vld [vmem:[#allocation11 + $0x58] sm:$0xff] }
 0x187   : > { %2267 = vmatprep.subr.bf16.mxu1 %v2266_v63  ;;  %v1043_v45 = vld [vmem:[#allocation11 + $0x20] sm:$0xff]  ;;  %v1048_v47 = vld [vmem:[#allocation11 + $0x48] sm:$0xff]  ;;  %v1049_v52 = vld [vmem:[#allocation11 + $0x50] sm:$0xff] }
 0x188   : > { %v2280_v49 = vpack.c.bf16 %v1045_v46, %v1043_v45  ;;  %v2282_v50 = vpack.c.bf16 %v1050_v48, %v1048_v47  ;;  %v1047_v51 = vld [vmem:[#allocation11 + $0x40] sm:$0xff]  ;;  %v1052_v53 = vld [vmem:[#allocation11 + $0x68] sm:$0xff]  ;;  %v1054_v54 = vld [vmem:[#allocation11 + $0x78] sm:$0xff] }
 0x189   : > { %2229 = vmatpush1.bf16.msra.mxu0 %v2228_v16  ;;  %v2284_v55 = vpack.c.bf16 %v1049_v52, %v1047_v51  ;;  %v2286_v56 = vpack.c.bf16 %v1054_v54, %v1052_v53  ;;  %v1051_v57 = vld [vmem:[#allocation11 + $0x60] sm:$0xff]  ;;  %v1053_v58 = vld [vmem:[#allocation11 + $0x70] sm:$0xff]  ;;  %v1056_v59 = vld [vmem:[#allocation11 + $0x88] sm:$0xff] }
 0x18a   : > { %2269 = vmatpush1.bf16.msra.mxu1 %v2268_v7  ;;  %2231 = vmatprep.subr.bf16.mxu0 %v2230_v18  ;;  %v1058_v60 = vld [vmem:[#allocation11 + $0x98] sm:$0xff]  ;;  %v2288_v61 = vpack.c.bf16 %v1053_v58, %v1051_v57  ;;  %v1055_v63 = vld [vmem:[#allocation11 + $0x80] sm:$0xff]  ;;  %v1057_v1 = vld [vmem:[#allocation11 + $0x90] sm:$0xff] }
 0x18b   : > { %2271 = vmatprep.subr.bf16.mxu1 %v2270_v12  ;;  %v2290_v62 = vpack.c.bf16 %v1058_v60, %v1056_v59  ;;  %v1060_v2 = vld [vmem:[#allocation11 + $0xa8] sm:$0xff]  ;;  %v1062_v3 = vld [vmem:[#allocation11 + $0xb8] sm:$0xff]  ;;  %v2292_v4 = vpack.c.bf16 %v1057_v1, %v1055_v63  ;;  %v1059_v6 = vld [vmem:[#allocation11 + $0xa0] sm:$0xff] }
 0x18c   : > { %v2294_v5 = vpack.c.bf16 %v1062_v3, %v1060_v2  ;;  %v1061_v7 = vld [vmem:[#allocation11 + $0xb0] sm:$0xff]  ;;  %v1064_v8 = vld [vmem:[#allocation11 + $0xc8] sm:$0xff]  ;;  %v1066_v9 = vld [vmem:[#allocation11 + $0xd8] sm:$0xff] }
 0x18d   : > { %2233 = vmatpush1.bf16.msra.mxu0 %v2232_v23  ;;  %v2296_v10 = vpack.c.bf16 %v1061_v7, %v1059_v6  ;;  %v2298_v11 = vpack.c.bf16 %v1066_v9, %v1064_v8  ;;  %v1063_v12 = vld [vmem:[#allocation11 + $0xc0] sm:$0xff]  ;;  %v1065_v13 = vld [vmem:[#allocation11 + $0xd0] sm:$0xff]  ;;  %v1068_v14 = vld [vmem:[#allocation11 + $0xe8] sm:$0xff] }
 0x18e   : > { %2273 = vmatpush1.bf16.msra.mxu1 %v2272_v17  ;;  %2235 = vmatprep.subr.bf16.mxu0 %v2234_v25  ;;  %v1070_v15 = vld [vmem:[#allocation11 + $0xf8] sm:$0xff]  ;;  %v2300_v16 = vpack.c.bf16 %v1065_v13, %v1063_v12  ;;  %v1067_v18 = vld [vmem:[#allocation11 + $0xe0] sm:$0xff]  ;;  %v1069_v19 = vld [vmem:[#allocation11 + $0xf0] sm:$0xff] }
 0x18f   : > { %v2302_v17 = vpack.c.bf16 %v1070_v15, %v1068_v14  ;;  %v1072_v20 = vld [vmem:[#allocation11 + $0x108] sm:$0xff]  ;;  %v1074_v21 = vld [vmem:[#allocation11 + $0x118] sm:$0xff]  ;;  %v2304_v22 = vpack.c.bf16 %v1069_v19, %v1067_v18  ;;  %v1073_v25 = vld [vmem:[#allocation11 + $0x110] sm:$0xff] }
 0x190   : > { %v2306_v23 = vpack.c.bf16 %v1074_v21, %v1072_v20  ;;  %v1076_v26 = vld [vmem:[#allocation11 + $0x128] sm:$0xff]  ;;  %v1078_v27 = vld [vmem:[#allocation11 + $0x138] sm:$0xff]  ;;  %v1087_v48 = vld [vmem:[#allocation11 + $0x180] sm:$0xff] }
 0x191   : > { %963 = vmatmul.mubr.f32.vlgmr.msra.gmra.mrb[0].mxu1 %v732_v24  ;;  %2237 = vmatpush1.bf16.msra.mxu0 %v2236_v30  ;;  %v1071_v24 = vld [vmem:[#allocation11 + $0x100] sm:$0xff]  ;;  %v2310_v29 = vpack.c.bf16 %v1078_v27, %v1076_v26  ;;  %v1080_v32 = vld [vmem:[#allocation11 + $0x148] sm:$0xff]  ;;  %v1082_v33 = vld [vmem:[#allocation11 + $0x158] sm:$0xff] }
 0x192   : > { %2239 = vmatprep.subr.bf16.mxu0 %v2238_v31  ;;  %v2308_v28 = vpack.c.bf16 %v1073_v25, %v1071_v24  ;;  %v1075_v30 = vld [vmem:[#allocation11 + $0x120] sm:$0xff]  ;;  %v1077_v31 = vld [vmem:[#allocation11 + $0x130] sm:$0xff]  ;;  %v2314_v35 = vpack.c.bf16 %v1082_v33, %v1080_v32  ;;  %v1084_v38 = vld [vmem:[#allocation11 + $0x168] sm:$0xff] }
 0x193   : > { %v2312_v34 = vpack.c.bf16 %v1077_v31, %v1075_v30  ;;  %v1086_v39 = vld [vmem:[#allocation11 + $0x178] sm:$0xff]  ;;  %v1091_v54 = vld [vmem:[#allocation11 + $0x1a0] sm:$0xff]  ;;  %v1100_v63 = vld [vmem:[#allocation11 + $0x1e8] sm:$0xff] }
 0x194   : > { %v2318_v41 = vpack.c.bf16 %v1086_v39, %v1084_v38  ;;  %v1090_v45 = vld [vmem:[#allocation11 + $0x198] sm:$0xff]  ;;  %v1095_v60 = vld [vmem:[#allocation11 + $0x1c0] sm:$0xff]  ;;  %v976_v6 = vld [vmem:[#allocation10 + $0x8] sm:$0xff] }
 0x195   : > { %2241 = vmatpush1.bf16.msra.mxu0 %v2240_v36  ;;  %v1079_v36 = vld [vmem:[#allocation11 + $0x140] sm:$0xff]  ;;  %v1094_v51 = vld [vmem:[#allocation11 + $0x1b8] sm:$0xff]  ;;  %v1266_v13 = vld [vmem:[#allocation13 + $0x8] sm:$0xff] }
 0x196   : > { %2275 = vmatprep.subr.bf16.mxu0 %v2274_v37  ;;  %v1081_v37 = vld [vmem:[#allocation11 + $0x150] sm:$0xff]  ;;  %v1098_v57 = vld [vmem:[#allocation11 + $0x1d8] sm:$0xff]  ;;  %v1099_v3 = vld [vmem:[#allocation11 + $0x1e0] sm:$0xff] }
 0x197   : > { %v2316_v40 = vpack.c.bf16 %v1081_v37, %v1079_v36  ;;  %v1102_v1 = vld [vmem:[#allocation11 + $0x1f8] sm:$0xff]  ;;  %v1281_v9 = vld [vmem:[#allocation13 + $0x80] sm:$0xff]  ;;  %v1283_v14 = vld [vmem:[#allocation13 + $0x90] sm:$0xff] }
 0x198   : > { %842 = vmatmul.mubr.f32.vlgmr.msra.gmra.mrb[0].mxu0 %v731_v42  ;;  %v1083_v42 = vld [vmem:[#allocation11 + $0x160] sm:$0xff]  ;;  %v2334_v2 = vpack.c.bf16 %v1102_v1, %v1100_v63  ;;  %v978_v7 = vld [vmem:[#allocation10 + $0x18] sm:$0xff]  ;;  %v1267_v18 = vld [vmem:[#allocation13 + $0x10] sm:$0xff] }
 0x199   : > { %2277 = vmatpush1.bf16.msra.mxu0 %v2276_v43  ;;  %v1085_v43 = vld [vmem:[#allocation11 + $0x170] sm:$0xff]  ;;  %v2338_v8 = vpack.c.bf16 %v978_v7, %v976_v6  ;;  %v1284_v15 = vld [vmem:[#allocation13 + $0x98] sm:$0xff]  ;;  %v1285_v20 = vld [vmem:[#allocation13 + $0xa0] sm:$0xff] }
 0x19a   : > { %2279 = vmatprep.subr.bf16.mxu0 %v2278_v44  ;;  %v1088_v44 = vld [vmem:[#allocation11 + $0x188] sm:$0xff]  ;;  %v2320_v46 = vpack.c.bf16 %v1085_v43, %v1083_v42  ;;  %v1268_v19 = vld [vmem:[#allocation13 + $0x18] sm:$0xff]  ;;  %v1269_v24 = vld [vmem:[#allocation13 + $0x20] sm:$0xff] }
 0x19b   : > { %v2322_v47 = vpack.c.bf16 %v1090_v45, %v1088_v44  ;;  %v1286_v21 = vld [vmem:[#allocation13 + $0xa8] sm:$0xff]  ;;  %v1287_v26 = vld [vmem:[#allocation13 + $0xb0] sm:$0xff]  ;;  %v1288_v27 = vld [vmem:[#allocation13 + $0xb8] sm:$0xff] }
 0x19c   : > { %v1270_v25 = vld [vmem:[#allocation13 + $0x28] sm:$0xff]  ;;  %v1271_v30 = vld [vmem:[#allocation13 + $0x30] sm:$0xff]  ;;  %v1272_v31 = vld [vmem:[#allocation13 + $0x38] sm:$0xff] }
 0x19d   : > { %2281 = vmatpush1.bf16.msra.mxu0 %v2280_v49  ;;  %v1089_v49 = vld [vmem:[#allocation11 + $0x190] sm:$0xff]  ;;  %v1289_v32 = vld [vmem:[#allocation13 + $0xc0] sm:$0xff]  ;;  %v1290_v33 = vld [vmem:[#allocation13 + $0xc8] sm:$0xff] }
 0x19e   : > { %2283 = vmatprep.subr.bf16.mxu0 %v2282_v50  ;;  %v1092_v50 = vld [vmem:[#allocation11 + $0x1a8] sm:$0xff]  ;;  %v2324_v52 = vpack.c.bf16 %v1089_v49, %v1087_v48  ;;  %v1273_v36 = vld [vmem:[#allocation13 + $0x40] sm:$0xff]  ;;  %v1291_v38 = vld [vmem:[#allocation13 + $0xd0] sm:$0xff]  ;;  %v767_v48 = vlaneseq }
 0x19f   : > { %v2326_v53 = vpack.c.bf16 %v1094_v51, %v1092_v50  ;;  %v1274_v37 = vld [vmem:[#allocation13 + $0x48] sm:$0xff]  ;;  %v1292_v39 = vld [vmem:[#allocation13 + $0xd8] sm:$0xff]  ;;  %v1275_v42 = vld [vmem:[#allocation13 + $0x50] sm:$0xff] }
 0x1a0   : > { %v1276_v43 = vld [vmem:[#allocation13 + $0x58] sm:$0xff]  ;;  %v1293_v44 = vld [vmem:[#allocation13 + $0xe0] sm:$0xff]  ;;  %v1294_v45 = vld [vmem:[#allocation13 + $0xe8] sm:$0xff]  ;;  %v768_v49 = vshrl.u32 %v767_v48, 7 }
 0x1a1   : > { %2285 = vmatpush1.bf16.msra.mxu0 %v2284_v55  ;;  %v1093_v55 = vld [vmem:[#allocation11 + $0x1b0] sm:$0xff]  ;;  %v886_v51 = vld [vmem:[%s3800_s17] sm:$0x3]  ;;  %v982_v63 = vld [vmem:[#allocation10 + $0x38] sm:$0xff]  ;;  %s1998_s17 = sshll.u32 %s3234_s0, 7  ;;  %s3122_s0 = smov [#allocation20]  }
 0x1a2   : > { %2287 = vmatprep.subr.bf16.mxu0 %v2286_v56  ;;  %v1096_v56 = vld [vmem:[#allocation11 + $0x1c8] sm:$0xff]  ;;  %v2328_v58 = vpack.c.bf16 %v1093_v55, %v1091_v54  ;;  %v3612_v50 = vsub.s32 0, %v768_v49  ;;  %v981_v6 = vld [vmem:[#allocation10 + $0x30] sm:$0xff]  ;;  %v3624_v7 = vld [vmem:[%s3801_s2] sm:$0x3]  ;;  %s3016_s9 = sshll.u32 %s3122_s0, 4  ;;  %s3017_s9 = int_to_ptr.vmem [resolvable:$false] %s3016_s9 }
 0x1a3   : > { %v2330_v59 = vpack.c.bf16 %v1098_v57, %v1096_v56  ;;  %p3019_p11 = scmp.lt.s32.totalorder %s3684_s7, %s3017_s9 }
 0x1a5   : > { %2289 = vmatpush1.bf16.msra.mxu0 %v2288_v61  ;;  %v1097_v61 = vld [vmem:[#allocation11 + $0x1d0] sm:$0xff] }
 0x1a6   : > { %2291 = vmatprep.subr.bf16.mxu0 %v2290_v62  ;;  %v2332_v62 = vpack.c.bf16 %v1097_v61, %v1095_v60  ;;  %v977_v60 = vld [vmem:[#allocation10 + $0x10] sm:$0xff] }
 0x1a9   : > { %2293 = vmatpush1.bf16.msra.mxu0 %v2292_v4  ;;  %v1101_v4 = vld [vmem:[#allocation11 + $0x1f0] sm:$0xff] }
 0x1aa   : > { %2295 = vmatprep.subr.bf16.mxu0 %v2294_v5  ;;  %v2336_v5 = vpack.c.bf16 %v1101_v4, %v1099_v3 }
 0x1ad   : > { %2297 = vmatpush1.bf16.msra.mxu0 %v2296_v10  ;;  %v1282_v10 = vld [vmem:[#allocation13 + $0x88] sm:$0xff] }
 0x1ae   : > { %2299 = vmatprep.subr.bf16.mxu0 %v2298_v11  ;;  %v1265_v11 = vld [vmem:[#allocation13] sm:$0xff]  ;;  %v2402_v12 = vpack.c.bf16 %v1282_v10, %v1281_v9  ;;  %v984_v9 = vld [vmem:[#allocation10 + $0x48] sm:$0xff]  ;;  %v986_v10 = vld [vmem:[#allocation10 + $0x58] sm:$0xff] }
 0x1b0   : > { %2403 = vmatprep.subr.bf16.mxu1 %v2402_v12 }
 0x1b1   : > { %2301 = vmatpush1.bf16.msra.mxu0 %v2300_v16  ;;  %v2404_v16 = vpack.c.bf16 %v1266_v13, %v1265_v11  ;;  %v2346_v13 = vpack.c.bf16 %v986_v10, %v984_v9  ;;  %v1020_v9 = vld [vmem:[#allocation10 + $0x168] sm:$0xff]  ;;  %v1022_v10 = vld [vmem:[#allocation10 + $0x178] sm:$0xff] }
 0x1b2   : > { %2303 = vmatprep.subr.bf16.mxu0 %v2302_v17  ;;  %v2406_v17 = vpack.c.bf16 %v1284_v15, %v1283_v14  ;;  %v983_v14 = vld [vmem:[#allocation10 + $0x40] sm:$0xff]  ;;  %v985_v15 = vld [vmem:[#allocation10 + $0x50] sm:$0xff] }
 0x1b3   : > { %2405 = vmatpush3.bf16.msra.mxu1 %v2404_v16  ;;  %v988_v16 = vld [vmem:[#allocation10 + $0x68] sm:$0xff] }
 0x1b4   : > { %2407 = vmatprep.subr.bf16.mxu1 %v2406_v17  ;;  %v990_v17 = vld [vmem:[#allocation10 + $0x78] sm:$0xff] }
 0x1b5   : > { %2305 = vmatpush1.bf16.msra.mxu0 %v2304_v22  ;;  %v2408_v22 = vpack.c.bf16 %v1268_v19, %v1267_v18 }
 0x1b6   : > { %2307 = vmatprep.subr.bf16.mxu0 %v2306_v23  ;;  %v2410_v23 = vpack.c.bf16 %v1286_v21, %v1285_v20  ;;  %v2348_v20 = vpack.c.bf16 %v985_v15, %v983_v14  ;;  %v1021_v14 = vld [vmem:[#allocation10 + $0x170] sm:$0xff]  ;;  %v1024_v15 = vld [vmem:[#allocation10 + $0x188] sm:$0xff] }
 0x1b7   : > { %2409 = vmatpush3.bf16.msra.mxu1 %v2408_v22  ;;  %v2350_v22 = vpack.c.bf16 %v990_v17, %v988_v16  ;;  %v1026_v16 = vld [vmem:[#allocation10 + $0x198] sm:$0xff] }
 0x1b8   : > { %2411 = vmatprep.subr.bf16.mxu1 %v2410_v23  ;;  %v987_v23 = vld [vmem:[#allocation10 + $0x60] sm:$0xff] }
 0x1b9   : > { %2309 = vmatpush1.bf16.msra.mxu0 %v2308_v28  ;;  %v2412_v28 = vpack.c.bf16 %v1270_v25, %v1269_v24  ;;  %v989_v24 = vld [vmem:[#allocation10 + $0x70] sm:$0xff]  ;;  %v992_v25 = vld [vmem:[#allocation10 + $0x88] sm:$0xff] }
 0x1ba   : > { %2311 = vmatprep.subr.bf16.mxu0 %v2310_v29  ;;  %v2414_v29 = vpack.c.bf16 %v1288_v27, %v1287_v26  ;;  %v994_v26 = vld [vmem:[#allocation10 + $0x98] sm:$0xff] }
 0x1bb   : > { %2413 = vmatpush3.bf16.msra.mxu1 %v2412_v28  ;;  %v2352_v28 = vpack.c.bf16 %v989_v24, %v987_v23  ;;  %v1030_v23 = vld [vmem:[#allocation10 + $0x1b8] sm:$0xff] }
 0x1bc   : > { %2415 = vmatprep.subr.bf16.mxu1 %v2414_v29 }
 0x1bd   : > { %2313 = vmatpush1.bf16.msra.mxu0 %v2312_v34  ;;  %v2416_v34 = vpack.c.bf16 %v1272_v31, %v1271_v30  ;;  %v2354_v30 = vpack.c.bf16 %v994_v26, %v992_v25  ;;  %v991_v31 = vld [vmem:[#allocation10 + $0x80] sm:$0xff] }
 0x1be   : > { %2315 = vmatprep.subr.bf16.mxu0 %v2314_v35  ;;  %v2418_v35 = vpack.c.bf16 %v1290_v33, %v1289_v32  ;;  %v993_v32 = vld [vmem:[#allocation10 + $0x90] sm:$0xff]  ;;  %v996_v33 = vld [vmem:[#allocation10 + $0xa8] sm:$0xff]  ;;  %v1027_v26 = vld [vmem:[#allocation10 + $0x1a0] sm:$0xff] }
 0x1bf   : > { %2417 = vmatpush3.bf16.msra.mxu1 %v2416_v34  ;;  %v998_v34 = vld [vmem:[#allocation10 + $0xb8] sm:$0xff] }
 0x1c0   : > { %2419 = vmatprep.subr.bf16.mxu1 %v2418_v35  ;;  %v2356_v35 = vpack.c.bf16 %v993_v32, %v991_v31  ;;  %v1031_v32 = vld [vmem:[#allocation10 + $0x1c0] sm:$0xff] }
 0x1c1   : > { %2317 = vmatpush1.bf16.msra.mxu0 %v2316_v40  ;;  %v2420_v40 = vpack.c.bf16 %v1274_v37, %v1273_v36  ;;  %v2358_v36 = vpack.c.bf16 %v998_v34, %v996_v33  ;;  %v995_v37 = vld [vmem:[#allocation10 + $0xa0] sm:$0xff]  ;;  %v1033_v33 = vld [vmem:[#allocation10 + $0x1d0] sm:$0xff]  ;;  %v770_v34 = vrot.slane %v3624_v7, %v3612_v50 }
 0x1c2   : > { %2319 = vmatprep.subr.bf16.mxu0 %v2318_v41  ;;  %v2422_v41 = vpack.c.bf16 %v1292_v39, %v1291_v38  ;;  %v997_v38 = vld [vmem:[#allocation10 + $0xb0] sm:$0xff]  ;;  %v1000_v39 = vld [vmem:[#allocation10 + $0xc8] sm:$0xff] }
 0x1c3   : > { %2421 = vmatpush3.bf16.msra.mxu1 %v2420_v40  ;;  %v1002_v40 = vld [vmem:[#allocation10 + $0xd8] sm:$0xff] }
 0x1c4   : > { %2423 = vmatprep.subr.bf16.mxu1 %v2422_v41  ;;  %v2360_v41 = vpack.c.bf16 %v997_v38, %v995_v37  ;;  %v2396_v37 = vpack.c.bf16 %v1033_v33, %v1031_v32  ;;  %v1401_v32 = vld [vmem:[#allocation14 + $0xd8] sm:$0xff] }
 0x1c5   : > { %2321 = vmatpush1.bf16.msra.mxu0 %v2320_v46  ;;  %v2424_v46 = vpack.c.bf16 %v1276_v43, %v1275_v42  ;;  %v2362_v42 = vpack.c.bf16 %v1002_v40, %v1000_v39  ;;  %v999_v43 = vld [vmem:[#allocation10 + $0xc0] sm:$0xff]  ;;  %v1037_v40 = vld [vmem:[#allocation10 + $0x1f0] sm:$0xff] }
 0x1c6   : > { %2323 = vmatprep.subr.bf16.mxu0 %v2322_v47  ;;  %v2426_v47 = vpack.c.bf16 %v1294_v45, %v1293_v44  ;;  %v1001_v44 = vld [vmem:[#allocation10 + $0xd0] sm:$0xff]  ;;  %v1004_v45 = vld [vmem:[#allocation10 + $0xe8] sm:$0xff]  ;;  %v1035_v39 = vld [vmem:[#allocation10 + $0x1e0] sm:$0xff] }
 0x1c7   : > { %2425 = vmatpush3.bf16.msra.mxu1 %v2424_v46  ;;  %v1006_v46 = vld [vmem:[#allocation10 + $0xf8] sm:$0xff] }
 0x1c8   : > { %2427 = vmatprep.subr.bf16.mxu1 %v2426_v47  ;;  %v2364_v47 = vpack.c.bf16 %v1001_v44, %v999_v43  ;;  %v2366_v48 = vpack.c.bf16 %v1006_v46, %v1004_v45  ;;  %v1277_v45 = vld [vmem:[#allocation13 + $0x60] sm:$0xff] }
 0x1c9   : > { %2325 = vmatpush1.bf16.msra.mxu0 %v2324_v52  ;;  %v3617_v52 = vsub.s32 1, %v768_v49  ;;  %v1003_v49 = vld [vmem:[#allocation10 + $0xe0] sm:$0xff] }
 0x1ca   : > { %2327 = vmatprep.subr.bf16.mxu0 %v2326_v53  ;;  %v891_v53 = vrot.slane %v886_v51, %v3612_v50 }
 0x1cb   : > { %v895_v54 = vrot.slane %v886_v51, %v3617_v52  ;;  %v774_v12 = vrot.slane %v3624_v7, %v3617_v52  ;;  %v1005_v51 = vld [vmem:[#allocation10 + $0xf0] sm:$0xff]  ;;  %v1278_v7 = vld [vmem:[#allocation13 + $0x68] sm:$0xff] }
 0x1cc   : > { %v2428_v46 = vpack.c.bf16 %v1278_v7, %v1277_v45 }
 0x1cd   : > { %2329 = vmatpush1.bf16.msra.mxu0 %v2328_v58 }
 0x1ce   : > { %2331 = vmatprep.subr.bf16.mxu0 %v2330_v59  ;;  %v975_v59 = vld [vmem:[#allocation10] sm:$0xff]  ;;  %2429 = vmatpush3.bf16.msra.mxu1 %v2428_v46  ;;  %v1388_v46 = vld [vmem:[#allocation14 + $0x70] sm:$0xff] }
 0x1d1   : > { %2333 = vmatpush1.bf16.msra.mxu0 %v2332_v62  ;;  %v980_v62 = vld [vmem:[#allocation10 + $0x28] sm:$0xff] }
 0x1d2   : > { %2335 = vmatprep.subr.bf16.mxu0 %v2334_v2  ;;  %v2340_v2 = vpack.c.bf16 %v977_v60, %v975_v59  ;;  %v2342_v4 = vpack.c.bf16 %v982_v63, %v980_v62  ;;  %v1012_v59 = vld [vmem:[#allocation10 + $0x128] sm:$0xff]  ;;  %v1014_v60 = vld [vmem:[#allocation10 + $0x138] sm:$0xff]  ;;  %v1011_v63 = vld [vmem:[#allocation10 + $0x120] sm:$0xff] }
 0x1d3   : > { %v2374_v62 = vpack.c.bf16 %v1014_v60, %v1012_v59 }
 0x1d5   : > { %2337 = vmatpush1.bf16.msra.mxu0 %v2336_v5  ;;  %v979_v5 = vld [vmem:[#allocation10 + $0x20] sm:$0xff] }
 0x1d6   : > { %2339 = vmatprep.subr.bf16.mxu0 %v2338_v8  ;;  %v2344_v11 = vpack.c.bf16 %v981_v6, %v979_v5  ;;  %v1015_v6 = vld [vmem:[#allocation10 + $0x140] sm:$0xff] }
 0x264   : > { %v964_v55 = vpop.f32.mrb[0].mxu1 }
 0x265   : > { %v965_v56 = vadd.f32 %v964_v55, %v891_v53  ;;  %v966_v57 = vpop.f32.mrb[1].mxu1  ;;  %v1008_v53 = vld [vmem:[#allocation10 + $0x108] sm:$0xff]  ;;  %v2368_v55 = vpack.c.bf16 %v1005_v51, %v1003_v49  ;;  %v1279_v51 = vld [vmem:[#allocation13 + $0x70] sm:$0xff] }
 0x266   : > { %v967_v58 = vadd.f32 %v966_v57, %v895_v54  ;;  %v1010_v54 = vld [vmem:[#allocation10 + $0x118] sm:$0xff]  ;;  %v1007_v57 = vld [vmem:[#allocation10 + $0x100] sm:$0xff] }
 0x267   : > { %v971_v61 = vmul.f32 0.01, %v965_v56  ;;  %vm969_vm0 = vcmp.ge.f32.partialorder %v965_v56, 0.0 }
 0x268   : > { %v972_v1 = vmul.f32 0.01, %v967_v58  ;;  %vm970_vm1 = vcmp.ge.f32.partialorder %v967_v58, 0.0 }
 0x269   : > { %v973_v8 = vsel %vm969_vm0, %v965_v56, %v971_v61  ;;  %v2370_v56 = vpack.c.bf16 %v1010_v54, %v1008_v53  ;;  %v1280_v53 = vld [vmem:[#allocation13 + $0x78] sm:$0xff] }
 0x26a   : > { %v974_v3 = vsel %vm970_vm1, %v967_v58, %v972_v1  ;;  %v1009_v58 = vld [vmem:[#allocation10 + $0x110] sm:$0xff]  ;;  %v2432_v54 = vpack.c.bf16 %v1280_v53, %v1279_v51 }
 0x26b   : > { %1167 = vmatprep.mubr.f32.mxu0 %v974_v3  ;;  %v3628_v18 = vpop.f32.mrb[0].mxu0  ;;  %v2372_v61 = vpack.c.bf16 %v1009_v58, %v1007_v57  ;;  %v1013_v1 = vld [vmem:[#allocation10 + $0x130] sm:$0xff]  ;;  %v1018_v3 = vld [vmem:[#allocation10 + $0x158] sm:$0xff]  ;;  %v1245_v57 = vld [vmem:[%s3802_s28] sm:$0x3]  ;;  %s3682_s28 = scalar_lea.hbm %s3806_s21, %s1998_s17 }
 0x26c   : > { %1168 = vmatmul.mubr.f32.vlgmr.msra.gmra.mrb[2].mxu0 %v973_v8  ;;  %v845_v19 = vpop.f32.mrb[1].mxu0  ;;  %v1017_v8 = vld [vmem:[#allocation10 + $0x150] sm:$0xff]  ;;  %v1250_v58 = vrot.slane %v1245_v57, %v3612_v50  ;;  %v1254_v59 = vrot.slane %v1245_v57, %v3617_v52  ;;  %v1377_v50 = vld [vmem:[#allocation14 + $0x18] sm:$0xff] }
 0x26d   : > { %2341 = vmatpush1.bf16.msra.mxu0 %v2340_v2  ;;  %v846_v21 = vadd.f32 %v845_v19, %v774_v12  ;;  %v1016_v2 = vld [vmem:[#allocation10 + $0x148] sm:$0xff]  ;;  %v2382_v12 = vpack.c.bf16 %v1022_v10, %v1020_v9  ;;  %v2386_v19 = vpack.c.bf16 %v1026_v16, %v1024_v15  ;;  %v1378_v16 = vld [vmem:[#allocation14 + $0x20] sm:$0xff] }
 0x26e   : > { %2343 = vmatprep.subr.bf16.mxu0 %v2342_v4  ;;  %v2376_v4 = vpack.c.bf16 %v1013_v1, %v1011_v63  ;;  %v2378_v5 = vpack.c.bf16 %v1018_v3, %v1016_v2  ;;  %v1374_v1 = vld [vmem:[#allocation14] sm:$0xff]  ;;  %v1375_v2 = vld [vmem:[#allocation14 + $0x8] sm:$0xff] }
 0x26f   : > { %v851_v27 = vmul.f32 0.01, %v846_v21  ;;  %vm849_vm2 = vcmp.ge.f32.partialorder %v846_v21, 0.0 }
 0x271   : > { %2345 = vmatpush1.bf16.msra.mxu0 %v2344_v11  ;;  %v853_v29 = vsel %vm849_vm2, %v846_v21, %v851_v27  ;;  %v2380_v11 = vpack.c.bf16 %v1017_v8, %v1015_v6  ;;  %v1025_v21 = vld [vmem:[#allocation10 + $0x190] sm:$0xff]  ;;  %v2436_v8 = vpack.c.bf16 %v1375_v2, %v1374_v1  ;;  %v1488_v2 = vld [vmem:[#allocation16 + $0x20] sm:$0xff] }
 0x272   : > { %2347 = vmatprep.subr.bf16.mxu0 %v2346_v13  ;;  %1238 = vmatprep.mubr.f32.mxu0 %v853_v29  ;;  %v1019_v13 = vld [vmem:[#allocation10 + $0x160] sm:$0xff]  ;;  %v1029_v27 = vld [vmem:[#allocation10 + $0x1b0] sm:$0xff]  ;;  %v1034_v29 = vld [vmem:[#allocation10 + $0x1d8] sm:$0xff] }
 0x273   : > { %v2384_v17 = vpack.c.bf16 %v1021_v14, %v1019_v13  ;;  %v1395_v13 = vld [vmem:[#allocation14 + $0xa8] sm:$0xff] }
 0x275   : > { %2349 = vmatpush1.bf16.msra.mxu0 %v2348_v20  ;;  %v1023_v20 = vld [vmem:[#allocation10 + $0x180] sm:$0xff] }
 0x276   : > { %2351 = vmatprep.subr.bf16.mxu0 %v2350_v22  ;;  %v1028_v22 = vld [vmem:[#allocation10 + $0x1a8] sm:$0xff]  ;;  %v2388_v24 = vpack.c.bf16 %v1025_v21, %v1023_v20  ;;  %v1397_v20 = vld [vmem:[#allocation14 + $0xb8] sm:$0xff] }
 0x277   : > { %v2390_v25 = vpack.c.bf16 %v1030_v23, %v1028_v22  ;;  %v1380_v23 = vld [vmem:[#allocation14 + $0x30] sm:$0xff] }
 0x279   : > { %2353 = vmatpush1.bf16.msra.mxu0 %v2352_v28  ;;  %v1032_v28 = vld [vmem:[#allocation10 + $0x1c8] sm:$0xff] }
 0x27a   : > { %2355 = vmatprep.subr.bf16.mxu0 %v2354_v30  ;;  %v2392_v30 = vpack.c.bf16 %v1029_v27, %v1027_v26  ;;  %v2394_v31 = vpack.c.bf16 %v1034_v29, %v1032_v28  ;;  %v1399_v26 = vld [vmem:[#allocation14 + $0xc8] sm:$0xff]  ;;  %v1382_v29 = vld [vmem:[#allocation14 + $0x40] sm:$0xff] }
 0x27d   : > { %2357 = vmatpush1.bf16.msra.mxu0 %v2356_v35  ;;  %v1036_v35 = vld [vmem:[#allocation10 + $0x1e8] sm:$0xff] }
 0x27e   : > { %2359 = vmatprep.subr.bf16.mxu0 %v2358_v36  ;;  %v1038_v36 = vld [vmem:[#allocation10 + $0x1f8] sm:$0xff] }
 0x27f   : > { %v2398_v38 = vpack.c.bf16 %v1038_v36, %v1036_v35  ;;  %v1384_v35 = vld [vmem:[#allocation14 + $0x50] sm:$0xff]  ;;  %v1385_v36 = vld [vmem:[#allocation14 + $0x58] sm:$0xff] }
 0x281   : > { %2361 = vmatpush1.bf16.msra.mxu0 %v2360_v41  ;;  %v844_v41 = vadd.f32 %v3628_v18, %v770_v34  ;;  %v1390_v18 = vld [vmem:[#allocation14 + $0x80] sm:$0xff] }
 0x282   : > { %2363 = vmatprep.subr.bf16.mxu0 %v2362_v42  ;;  %v2400_v42 = vpack.c.bf16 %v1037_v40, %v1035_v39  ;;  %v2456_v39 = vpack.c.bf16 %v1385_v36, %v1384_v35  ;;  %v1594_v36 = vld [vmem:[#allocation17] sm:$0xff] }
 0x283   : > { %v850_v43 = vmul.f32 0.01, %v844_v41  ;;  %vm848_vm3 = vcmp.ge.f32.partialorder %v844_v41, 0.0 }
 0x285   : > { %2365 = vmatpush1.bf16.msra.mxu0 %v2364_v47  ;;  %v852_v44 = vsel %vm848_vm3, %v844_v41, %v850_v43  ;;  %v1295_v47 = vld [vmem:[#allocation13 + $0xf0] sm:$0xff]  ;;  %v1386_v41 = vld [vmem:[#allocation14 + $0x60] sm:$0xff] }
 0x286   : > { %2367 = vmatprep.subr.bf16.mxu0 %v2366_v48  ;;  %v1296_v48 = vld [vmem:[#allocation13 + $0xf8] sm:$0xff]  ;;  %v1404_v43 = vld [vmem:[#allocation14 + $0xf0] sm:$0xff] }
 0x287   : > { %v2430_v49 = vpack.c.bf16 %v1296_v48, %v1295_v47  ;;  %v1389_v47 = vld [vmem:[#allocation14 + $0x78] sm:$0xff]  ;;  %v1500_v48 = vld [vmem:[#allocation16 + $0x80] sm:$0xff] }
 0x288   : > { %v2464_v51 = vpack.c.bf16 %v1389_v47, %v1388_v46  ;;  %v1602_v47 = vld [vmem:[#allocation17 + $0x40] sm:$0xff] }
 0x289   : > { %2369 = vmatpush1.bf16.msra.mxu0 %v2368_v55  ;;  %2431 = vmatprep.subr.bf16.mxu1 %v2430_v49  ;;  %v1391_v55 = vld [vmem:[#allocation14 + $0x88] sm:$0xff] }
 0x28a   : > { %2371 = vmatprep.subr.bf16.mxu0 %v2370_v56  ;;  %2433 = vmatpush3.bf16.msra.mxu1 %v2432_v54  ;;  %v2434_v56 = vpack.c.bf16 %v1391_v55, %v1390_v18  ;;  %v1501_v49 = vld [vmem:[#allocation16 + $0x88] sm:$0xff]  ;;  %v1484_v54 = vld [vmem:[#allocation16] sm:$0xff]  ;;  %v1502_v55 = vld [vmem:[#allocation16 + $0x90] sm:$0xff] }
 0x28b   : > { %v2466_v53 = vpack.c.bf16 %v1501_v49, %v1500_v48  ;;  %v1485_v18 = vld [vmem:[#allocation16 + $0x8] sm:$0xff] }
 0x28c   : > { %2435 = vmatprep.subr.bf16.mxu1 %v2434_v56  ;;  %v1503_v56 = vld [vmem:[#allocation16 + $0x98] sm:$0xff]  ;;  %v2468_v57 = vpack.c.bf16 %v1485_v18, %v1484_v54  ;;  %v1603_v48 = vld [vmem:[#allocation17 + $0x48] sm:$0xff]  ;;  %v1606_v18 = vld [vmem:[#allocation17 + $0x60] sm:$0xff] }
 0x28d   : > { %2373 = vmatpush1.bf16.msra.mxu0 %v2372_v61  ;;  %v2511_v49 = vpack.c.bf16 %v1603_v48, %v1602_v47 }
 0x28e   : > { %2375 = vmatprep.subr.bf16.mxu0 %v2374_v62 }
 0x291   : > { %2377 = vmatpush1.bf16.msra.mxu0 %v2376_v4  ;;  %v1392_v4 = vld [vmem:[#allocation14 + $0x90] sm:$0xff] }
 0x292   : > { %2379 = vmatprep.subr.bf16.mxu0 %v2378_v5  ;;  %v1393_v5 = vld [vmem:[#allocation14 + $0x98] sm:$0xff] }
 0x293   : > { %v2438_v10 = vpack.c.bf16 %v1393_v5, %v1392_v4  ;;  %v1506_v4 = vld [vmem:[#allocation16 + $0xb0] sm:$0xff]  ;;  %v1507_v5 = vld [vmem:[#allocation16 + $0xb8] sm:$0xff] }
 0x295   : > { %2381 = vmatpush1.bf16.msra.mxu0 %v2380_v11  ;;  %v1376_v11 = vld [vmem:[#allocation14 + $0x10] sm:$0xff] }
 0x296   : > { %2383 = vmatprep.subr.bf16.mxu0 %v2382_v12  ;;  %v1394_v12 = vld [vmem:[#allocation14 + $0xa0] sm:$0xff]  ;;  %v2440_v14 = vpack.c.bf16 %v1377_v50, %v1376_v11  ;;  %v1491_v11 = vld [vmem:[#allocation16 + $0x38] sm:$0xff] }
 0x297   : > { %v2442_v15 = vpack.c.bf16 %v1395_v13, %v1394_v12  ;;  %v1508_v50 = vld [vmem:[#allocation16 + $0xc0] sm:$0xff]  ;;  %v1509_v12 = vld [vmem:[#allocation16 + $0xc8] sm:$0xff] }
 0x299   : > { %2385 = vmatpush1.bf16.msra.mxu0 %v2384_v17  ;;  %v1379_v17 = vld [vmem:[#allocation14 + $0x28] sm:$0xff] }
 0x29a   : > { %2387 = vmatprep.subr.bf16.mxu0 %v2386_v19  ;;  %v1396_v19 = vld [vmem:[#allocation14 + $0xb0] sm:$0xff]  ;;  %v2444_v21 = vpack.c.bf16 %v1379_v17, %v1378_v16  ;;  %v1511_v17 = vld [vmem:[#allocation16 + $0xd8] sm:$0xff] }
 0x29b   : > { %v2446_v22 = vpack.c.bf16 %v1397_v20, %v1396_v19  ;;  %v1510_v16 = vld [vmem:[#allocation16 + $0xd0] sm:$0xff] }
 0x29c   : > { %v2486_v20 = vpack.c.bf16 %v1511_v17, %v1510_v16 }
 0x29d   : > { %2389 = vmatpush1.bf16.msra.mxu0 %v2388_v24  ;;  %v1381_v24 = vld [vmem:[#allocation14 + $0x38] sm:$0xff] }
 0x29e   : > { %2391 = vmatprep.subr.bf16.mxu0 %v2390_v25  ;;  %v1398_v25 = vld [vmem:[#allocation14 + $0xc0] sm:$0xff]  ;;  %v2448_v27 = vpack.c.bf16 %v1381_v24, %v1380_v23  ;;  %v1513_v24 = vld [vmem:[#allocation16 + $0xe8] sm:$0xff] }
 0x29f   : > { %v2450_v28 = vpack.c.bf16 %v1399_v26, %v1398_v25  ;;  %v1512_v23 = vld [vmem:[#allocation16 + $0xe0] sm:$0xff] }
 0x2a0   : > { %v2490_v26 = vpack.c.bf16 %v1513_v24, %v1512_v23 }
 0x2a1   : > { %2393 = vmatpush1.bf16.msra.mxu0 %v2392_v30  ;;  %v1383_v30 = vld [vmem:[#allocation14 + $0x48] sm:$0xff] }
 0x2a2   : > { %2395 = vmatprep.subr.bf16.mxu0 %v2394_v31  ;;  %v1400_v31 = vld [vmem:[#allocation14 + $0xd0] sm:$0xff]  ;;  %v2452_v33 = vpack.c.bf16 %v1383_v30, %v1382_v29  ;;  %v1515_v30 = vld [vmem:[#allocation16 + $0xf8] sm:$0xff] }
 0x2a3   : > { %v2454_v34 = vpack.c.bf16 %v1401_v32, %v1400_v31  ;;  %v1514_v29 = vld [vmem:[#allocation16 + $0xf0] sm:$0xff] }
 0x2a4   : > { %v2494_v32 = vpack.c.bf16 %v1515_v30, %v1514_v29 }
 0x2a5   : > { %2397 = vmatpush1.bf16.msra.mxu0 %v2396_v37  ;;  %v1402_v37 = vld [vmem:[#allocation14 + $0xe0] sm:$0xff] }
 0x2a6   : > { %2399 = vmatprep.subr.bf16.mxu0 %v2398_v38  ;;  %v1403_v38 = vld [vmem:[#allocation14 + $0xe8] sm:$0xff] }
 0x2a7   : > { %v2458_v40 = vpack.c.bf16 %v1403_v38, %v1402_v37  ;;  %v1595_v37 = vld [vmem:[#allocation17 + $0x8] sm:$0xff]  ;;  %v1596_v38 = vld [vmem:[#allocation17 + $0x10] sm:$0xff] }
 0x2a9   : > { %2401 = vmatpush1.bf16.msra.mxu0 %v2400_v42  ;;  %v1387_v42 = vld [vmem:[#allocation14 + $0x68] sm:$0xff] }
 0x2aa   : > { %v2460_v45 = vpack.c.bf16 %v1387_v42, %v1386_v41  ;;  %v1597_v41 = vld [vmem:[#allocation17 + $0x18] sm:$0xff] }
 0x2ab   : > { %v2502_v42 = vpack.c.bf16 %v1597_v41, %v1596_v38 }
 0x2ac   : > { %1239 = vmatmul.mubr.f32.vlgmr.msra.gmra.mrb[2].mxu0 %v852_v44  ;;  %v1405_v44 = vld [vmem:[#allocation14 + $0xf8] sm:$0xff] }
 0x2ad   : > { %v2462_v7 = vpack.c.bf16 %v1405_v44, %v1404_v43  ;;  %v1598_v43 = vld [vmem:[#allocation17 + $0x20] sm:$0xff]  ;;  %v1599_v44 = vld [vmem:[#allocation17 + $0x28] sm:$0xff]  ;;  %2207 = vmatprep.mubr.msk.f32.mxu0 %vm3121_vm6, %v3119_v0 }
 0x37f   : > { %v1240_v60 = vpop.f32.mrb[2].mxu0 }
 0x380   : > { %v1257_v61 = vadd.f32 %v1250_v58, %v1240_v60  ;;  %v1242_v62 = vpop.f32.mrb[3].mxu0  ;;  %v2470_v58 = vpack.c.bf16 %v1503_v56, %v1502_v55  ;;  %v1487_v60 = vld [vmem:[#allocation16 + $0x18] sm:$0xff]  ;;  %v1607_v55 = vld [vmem:[#allocation17 + $0x68] sm:$0xff] }
 0x381   : > { %v1258_v63 = vadd.f32 %v1254_v59, %v1242_v62  ;;  %v1486_v59 = vld [vmem:[#allocation16 + $0x10] sm:$0xff]  ;;  %v1505_v62 = vld [vmem:[#allocation16 + $0xa8] sm:$0xff]  ;;  %v2517_v56 = vpack.c.bf16 %v1607_v55, %v1606_v18 }
 0x382   : > { %v1261_v3 = vmul.f32 0.01, %v1257_v61  ;;  %vm1259_vm4 = vcmp.ge.f32.partialorder %v1257_v61, 0.0 }
 0x383   : > { %v1262_v6 = vmul.f32 0.01, %v1258_v63  ;;  %vm1260_vm5 = vcmp.ge.f32.partialorder %v1258_v63, 0.0 }
 0x384   : > { %v3641_v52 = vsel %vm1259_vm4, %v1257_v61, %v1261_v3  ;;  %v1504_v61 = vld [vmem:[#allocation16 + $0xa0] sm:$0xff]  ;;  %v1489_v3 = vld [vmem:[#allocation16 + $0x28] sm:$0xff] }
 0x385   : > { %v3638_v9 = vsel %vm1260_vm5, %v1258_v63, %v1262_v6  ;;  %v2472_v63 = vpack.c.bf16 %v1487_v60, %v1486_v59  ;;  %v2474_v1 = vpack.c.bf16 %v1505_v62, %v1504_v61  ;;  %v2476_v6 = vpack.c.bf16 %v1489_v3, %v1488_v2  ;;  %v1681_v60 = vld [vmem:[#allocation19] sm:$0xff]  ;;  %v1682_v61 = vld [vmem:[#allocation19 + $0x8] sm:$0xff]  ;;  %v1683_v62 = vld [vmem:[#allocation19 + $0x10] sm:$0xff] }
 0x386   : > { %1368 = vmatprep.mubr.f32.mxu1 %v3638_v9  ;;  %v1686_v3 = vld [vmem:[#allocation19 + $0x28] sm:$0xff] }
 0x387   : > { %1369 = vmatmul.mubr.f32.vlgmr.msra.gmra.mrb[2].mxu1 %v3641_v52 }
 0x388   : > { %2437 = vmatpush3.bf16.msra.mxu1 %v2436_v8  ;;  %1477 = vmatprep.mubr.f32.mxu1 %v3638_v9  ;;  %v2478_v8 = vpack.c.bf16 %v1507_v5, %v1506_v4  ;;  %v1687_v5 = vld [vmem:[#allocation19 + $0x30] sm:$0xff] }
 0x389   : > { %2439 = vmatprep.subr.bf16.mxu1 %v2438_v10  ;;  %v1490_v10 = vld [vmem:[#allocation16 + $0x30] sm:$0xff] }
 0x38a   : > { %v2480_v13 = vpack.c.bf16 %v1491_v11, %v1490_v10  ;;  %v1689_v10 = vld [vmem:[#allocation19 + $0x40] sm:$0xff]  ;;  %v1690_v11 = vld [vmem:[#allocation19 + $0x48] sm:$0xff] }
 0x38c   : > { %2441 = vmatpush3.bf16.msra.mxu1 %v2440_v14  ;;  %v2482_v14 = vpack.c.bf16 %v1509_v12, %v1508_v50  ;;  %v2535_v50 = vpack.c.bf16 %v1690_v11, %v1689_v10  ;;  %v1691_v12 = vld [vmem:[#allocation19 + $0x50] sm:$0xff] }
 0x38d   : > { %2443 = vmatprep.subr.bf16.mxu1 %v2442_v15  ;;  %v1493_v15 = vld [vmem:[#allocation16 + $0x48] sm:$0xff] }
 0x390   : > { %2445 = vmatpush3.bf16.msra.mxu1 %v2444_v21  ;;  %v1494_v21 = vld [vmem:[#allocation16 + $0x50] sm:$0xff] }
 0x391   : > { %2447 = vmatprep.subr.bf16.mxu1 %v2446_v22  ;;  %v1495_v22 = vld [vmem:[#allocation16 + $0x58] sm:$0xff] }
 0x392   : > { %v2488_v25 = vpack.c.bf16 %v1495_v22, %v1494_v21  ;;  %v1995_v22 = vld [vmem:[%s3803_s12] ss:$0 sm:$0xff]  ;;  %s3018_s12 = scalar_lea.vmem %s3017_s9, 256 }
 0x393   : > { %p3020_p8 = scmp.lt.s32.totalorder %s3018_s12, %s3012_s22 }
 0x394   : > { %2449 = vmatpush3.bf16.msra.mxu1 %v2448_v27  ;;  %v1496_v27 = vld [vmem:[#allocation16 + $0x60] sm:$0xff] }
 0x395   : > { %2451 = vmatprep.subr.bf16.mxu1 %v2450_v28  ;;  %v1497_v28 = vld [vmem:[#allocation16 + $0x68] sm:$0xff]  ;;  %p3021_p4 = por %p3020_p8, %p3019_p11 }
 0x396   : > { %v2492_v31 = vpack.c.bf16 %v1497_v28, %v1496_v27  ;;  %v2699_v27 = vld [vmem:[%s639_s8] sm:$0xff] }
 0x397   : > { %p3022_p12 = pnand %p3021_p4, %p3015_p7 }
 0x398   : > { %2453 = vmatpush3.bf16.msra.mxu1 %v2452_v33  ;;  %v1498_v33 = vld [vmem:[#allocation16 + $0x70] sm:$0xff] }
 0x399   : > { %2455 = vmatprep.subr.bf16.mxu1 %v2454_v34  ;;  %v1499_v34 = vld [vmem:[#allocation16 + $0x78] sm:$0xff] }
 0x39a   : > { %v2496_v35 = vpack.c.bf16 %v1499_v34, %v1498_v33  ;;  %v1696_v33 = vld [vmem:[#allocation19 + $0x78] sm:$0xff] }
 0x39c   : > { %2457 = vmatpush3.bf16.msra.mxu1 %v2456_v39  ;;  %v3120_v39 = vmov 0.0|0.0  }
 0x39d   : > { %2459 = vmatprep.subr.bf16.mxu1 %v2458_v40  ;;  %v2499_v40 = vpack.c.bf16 %v1595_v37, %v1594_v36  ;;  %2522 = vmatprep.subr.bf16.mxu0 %v3120_v39 }
 0x3a0   : > { %2461 = vmatpush3.bf16.msra.mxu1 %v2460_v45  ;;  %v2505_v45 = vpack.c.bf16 %v1599_v44, %v1598_v43  ;;  %v1994_v43 = vld [vmem:[%s3805_s13] ss:$0 sm:$0xff] }
 0x3a1   : > { %2463 = vmatprep.subr.bf16.mxu1 %v2462_v7  ;;  %v1601_v7 = vld [vmem:[#allocation17 + $0x38] sm:$0xff] }
 0x3a4   : > { %2465 = vmatpush3.bf16.msra.mxu1 %v2464_v51  ;;  %v1604_v51 = vld [vmem:[#allocation17 + $0x50] sm:$0xff] }
 0x3a5   : > { %2467 = vmatprep.subr.bf16.mxu1 %v2466_v53  ;;  %v1605_v53 = vld [vmem:[#allocation17 + $0x58] sm:$0xff] }
 0x3a6   : > { %v2514_v54 = vpack.c.bf16 %v1605_v53, %v1604_v51 }
 0x3a7   : > { %1478 = vmatmul.mubr.f32.vlgmr.msra.gmra.mrb[4].mxu1 %v3641_v52 }
 0x3a8   : > { %2469 = vmatpush3.bf16.msra.mxu1 %v2468_v57  ;;  %1587 = vmatprep.mubr.f32.mxu1 %v3638_v9  ;;  %v1492_v9 = vld [vmem:[#allocation16 + $0x40] sm:$0xff]  ;;  %v1608_v57 = vld [vmem:[#allocation17 + $0x70] sm:$0xff] }
 0x3a9   : > { %2471 = vmatprep.subr.bf16.mxu1 %v2470_v58  ;;  %v2484_v19 = vpack.c.bf16 %v1493_v15, %v1492_v9  ;;  %v1609_v58 = vld [vmem:[#allocation17 + $0x78] sm:$0xff]  ;;  %v1693_v9 = vld [vmem:[#allocation19 + $0x60] sm:$0xff]  ;;  %v1694_v15 = vld [vmem:[#allocation19 + $0x68] sm:$0xff] }
 0x3aa   : > { %v2520_v59 = vpack.c.bf16 %v1609_v58, %v1608_v57  ;;  %v2541_v16 = vpack.c.bf16 %v1694_v15, %v1693_v9 }
 0x3ac   : > { %2473 = vmatpush3.bf16.msra.mxu1 %v2472_v63  ;;  %v2523_v63 = vpack.c.bf16 %v1682_v61, %v1681_v60 }
 0x3ad   : > { %2475 = vmatprep.subr.bf16.mxu1 %v2474_v1  ;;  %v1684_v1 = vld [vmem:[#allocation19 + $0x18] sm:$0xff] }
 0x3ae   : > { %2524 = vmatpush3.bf16.msra.mxu0 %v2523_v63  ;;  %v2526_v2 = vpack.c.bf16 %v1684_v1, %v1683_v62 }
 0x3af   : > { %2525 = vmatprep.subr.bf16.mxu0 %v3120_v39 }
 0x3b0   : > { %2477 = vmatpush3.bf16.msra.mxu1 %v2476_v6  ;;  %v1688_v6 = vld [vmem:[#allocation19 + $0x38] sm:$0xff] }
 0x3b1   : > { %2479 = vmatprep.subr.bf16.mxu1 %v2478_v8  ;;  %v2532_v8 = vpack.c.bf16 %v1688_v6, %v1687_v5 }
 0x3b2   : > { %2527 = vmatpush3.bf16.msra.mxu0 %v2526_v2 }
 0x3b3   : > { %2528 = vmatprep.subr.bf16.mxu0 %v3120_v39 }
 0x3b4   : > { %2481 = vmatpush3.bf16.msra.mxu1 %v2480_v13  ;;  %v1692_v13 = vld [vmem:[#allocation19 + $0x58] sm:$0xff] }
 0x3b5   : > { %2483 = vmatprep.subr.bf16.mxu1 %v2482_v14  ;;  %v2538_v14 = vpack.c.bf16 %v1692_v13, %v1691_v12 }
 0x3b8   : > { %2485 = vmatpush3.bf16.msra.mxu1 %v2484_v19 }
 0x3b9   : > { %2487 = vmatprep.subr.bf16.mxu1 %v2486_v20 }
 0x3bc   : > { %2489 = vmatpush3.bf16.msra.mxu1 %v2488_v25 }
 0x3bd   : > { %2491 = vmatprep.subr.bf16.mxu1 %v2490_v26 }
 0x3c0   : > { %2493 = vmatpush3.bf16.msra.mxu1 %v2492_v31 }
 0x3c1   : > { %2495 = vmatprep.subr.bf16.mxu1 %v2494_v32  ;;  %v1695_v32 = vld [vmem:[#allocation19 + $0x70] sm:$0xff] }
 0x3c2   : > { %v2544_v34 = vpack.c.bf16 %v1696_v33, %v1695_v32 }
 0x3c4   : > { %2497 = vmatpush3.bf16.msra.mxu1 %v2496_v35  ;;  %v1996_v35 = vld [vmem:[%s3804_s1] ss:$0 sm:$0xff] }
 0x3c5   : > { %2498 = vmatprep.subr.bf16.mxu1 %v3120_v39 }
 0x3c7   : > { %1588 = vmatmul.mubr.f32.vlgmr.msra.gmra.mrb[6].mxu1 %v3641_v52  ;;  %v1600_v52 = vld [vmem:[#allocation17 + $0x30] sm:$0xff] }
 0x3c8   : > { %2500 = vmatpush3.bf16.msra.mxu1 %v2499_v40  ;;  %v2508_v46 = vpack.c.bf16 %v1601_v7, %v1600_v52  ;;  %2172 = vmatprep.mubr.msk.f32.mxu1 %vm3121_vm6, %v3119_v0  ;;  %v1685_v0 = vld [vmem:[#allocation19 + $0x20] sm:$0xff] }
 0x3c9   : > { %2501 = vmatprep.subr.bf16.mxu1 %v3120_v39  ;;  %v2529_v4 = vpack.c.bf16 %v1686_v3, %v1685_v0 }
 0x3cb   : > { %2530 = vmatpush3.bf16.msra.mxu0 %v2529_v4 }
 0x3cc   : > { %2503 = vmatpush3.bf16.msra.mxu1 %v2502_v42  ;;  %2531 = vmatprep.subr.bf16.mxu0 %v3120_v39 }
 0x3cd   : > { %2504 = vmatprep.subr.bf16.mxu1 %v3120_v39 }
 0x3cf   : > { %2533 = vmatpush3.bf16.msra.mxu0 %v2532_v8 }
 0x3d0   : > { %2506 = vmatpush3.bf16.msra.mxu1 %v2505_v45  ;;  %2534 = vmatprep.subr.bf16.mxu0 %v3120_v39 }
 0x3d1   : > { %2507 = vmatprep.subr.bf16.mxu1 %v3120_v39 }
 0x3d3   : > { %2536 = vmatpush3.bf16.msra.mxu0 %v2535_v50 }
 0x3d4   : > { %2509 = vmatpush3.bf16.msra.mxu1 %v2508_v46  ;;  %2537 = vmatprep.subr.bf16.mxu0 %v3120_v39 }
 0x3d5   : > { %2510 = vmatprep.subr.bf16.mxu1 %v3120_v39 }
 0x3d7   : > { %2539 = vmatpush3.bf16.msra.mxu0 %v2538_v14 }
 0x3d8   : > { %2512 = vmatpush3.bf16.msra.mxu1 %v2511_v49  ;;  %2540 = vmatprep.subr.bf16.mxu0 %v3120_v39 }
 0x3d9   : > { %2513 = vmatprep.subr.bf16.mxu1 %v3120_v39 }
 0x3db   : > { %2542 = vmatpush3.bf16.msra.mxu0 %v2541_v16 }
 0x3dc   : > { %2515 = vmatpush3.bf16.msra.mxu1 %v2514_v54  ;;  %2543 = vmatprep.subr.bf16.mxu0 %v3120_v39 }
 0x3dd   : > { %2516 = vmatprep.subr.bf16.mxu1 %v3120_v39 }
 0x3df   : > { %2545 = vmatpush3.bf16.msra.mxu0 %v2544_v34 }
 0x3e0   : > { %2518 = vmatpush3.bf16.msra.mxu1 %v2517_v56 }
 0x3e1   : > { %2519 = vmatprep.subr.bf16.mxu1 %v3120_v39 }
 0x3e4   : > { %2521 = vmatpush3.bf16.msra.mxu1 %v2520_v59 }
 0x45a   : > { %v2033_v17 = vpop.f32.mrb[2].mxu1 }
 0x45b   : > { %v2034_v19 = vpop.f32.mrb[3].mxu1 }
 0x45c   : > { %v2035_v20 = vadd.f32 %v2034_v19, %v2033_v17 }
 0x45e   : > { %v1371_v45 = vadd.f32 %v2035_v20, %v1994_v43 }
 0x47a   : > { %v2068_v21 = vpop.f32.mrb[4].mxu1 }
 0x47b   : > { %v2069_v23 = vpop.f32.mrb[5].mxu1 }
 0x47c   : > { %v2070_v24 = vadd.f32 %v2069_v23, %v2068_v21 }
 0x47e   : > { %v1480_v25 = vadd.f32 %v2070_v24, %v1995_v22 }
 0x480   : > { %2697 = vtanh.f32 %v1480_v25 }
 0x48a   : > { %v2698_v26 = vpop.eup %2697 }
 0x48b   : > { %v1593_v28 = vsub.f32 %v2699_v27, %v2698_v26 }
 0x48d   : > { %2173 = vmatmul.mubr.f32.vlgmr.msra.gmra.mrb[8].mxu1 %v1593_v28 }
 0x49a   : > { %v2103_v29 = vpop.f32.mrb[6].mxu1 }
 0x49b   : > { %v2104_v30 = vpop.f32.mrb[7].mxu1 }
 0x49c   : > { %v2105_v31 = vadd.f32 %v2104_v30, %v2103_v29 }
 0x49e   : > { %v1590_v36 = vadd.f32 %v2105_v31, %v1996_v35 }
 0x560   : > { %v1676_v37 = vpop.f32.mrb[8].mxu1 }
 0x561   : > { %v1680_v38 = vmul.f32 %v1676_v37, %v1590_v36  ;;  %v2174_v39 = vpop.f32.mrb[9].mxu1 }
 0x563   : > { %2208 = vmatmul.mubr.f32.vlgmr.msra.gmra.mrb[4].mxu0 %v1680_v38 }
 0x636   : > { %v1763_v40 = vpop.f32.mrb[4].mxu0 }
 0x637   : > { %v2209_v41 = vpop.f32.mrb[5].mxu0  ;;  %v1767_v42 = vmul.f32 %v1763_v40, %v1763_v40 }
 0x639   : > { %1768 = vadd.xlane.f32.xlu0 %v1767_v42 }
 0x6c6   : > { %v1769_v44 = vpop.xlane.xlu0 %1768 }
 0x6c7   : > { %v1770_v52 = vmul.f32 -0.5, %v1769_v44 }
 0x6c9   : > { %v1771_v7 = vsub.f32 %v1770_v52, %v1371_v45 }
 0x6cb   : > { %1772 = vst [vmem:[%s730_s5] sm:$0xff] %v1771_v7 }
 0x6cc   : > { %3025 = shalt.err (!%p3022_p12)
}
 0x6cd   : > { %s3026_s6 = scalar_lea.hbm %s3682_s28, 128  ;;  %s3030_s1 = scalar_lea.hbm %s3806_s21, 256 }
 0x6ce   : > { %p3027_p1 = scmp.ne.s32.totalorder %s3682_s28, %s3026_s6  ;;  %p3031_p2 = scmp.lt.u32.totalorder %s3682_s28, %s3806_s21 }
 0x6cf   : > { %p3032_p6 = scmp.lt.u32.totalorder %s3030_s1, %s3026_s6  ;;  %p3034_p5 = scmp.lt.u32.totalorder %s3026_s6, %s3682_s28 }
 0x6d0   : > { %p3028_p13 = pnand %p3027_p1, %p3807_p9 }
 0x6d1   : > { %p3033_p10 = por %p3032_p6, %p3031_p2 }
 0x6d2   : > { %p3029_p0 = pneg %p3028_p13 }
 0x6d3   : > { %p3035_p3 = por %p3034_p5, %p3033_p10 }
 0x6d5   : > { %p3036_p7 = pnand %p3035_p3, %p3029_p0 }
 0x6d7   : > { %3039 = shalt.err (!%p3036_p7)
}
 0x6d8   : > { %2588 = dma.vmem_to_hbm [thread:$0]  (%p3807_p9), %s3684_s7, 128, %s3682_s28, %s1774_s10  }
 0x6d9 PF: > { %s1799_s13 = sand.u32 1, %s3090_s24   ;;  %p3808_p11 = scmp.ne.s32.totalorder %s3784_s19, 0 }
 0x6da   : > { %p3809_p8 = scmp.ge.s32.totalorder %s3102_s27, 2  ;;  %s1800_s17 = scalar_lea.sflag [#allocation4], %s1799_s13 }
 0x6dc   : > { %p2626_p4 = pnand %p3809_p8, %p3808_p11 }
 0x6de   : > { %3085 = dma.done.wait (!%p2626_p4), %s1800_s17, 128  }
 0x6df   : > { %3087 = vsyncadd (!%p2626_p4), %s1800_s17, 4294967168  ;;  %p37_p12 = scmp.ge.s32.totalorder %s3470_s18, 4   ;;  %s3810_s24 = smov %s3094_s25 }
 0x6e0   : > { %s3811_s25 = smov %s3098_s26  ;;  %s3812_s26 = smov %s3482_s20 }
 0x6e1   : > { %s3813_s27 = smov %s3470_s18  ;;  %39 = sbr.rel (!%p37_p12) target bundleno = 28 (0x1c), region = 182 }
 0x6e8   :  { %1805 = vsyncpa [#allocation3], 1 }
 0x6e9   :  { %1807 = vsyncpa [#allocation3 + $0x1], 1 }
 0x6ea   :  { %1808 = vsyncpa [#allocation6], 1 }
 0x6eb   :  { %1810 = vsyncpa [#allocation6 + $0x1], 1 }
 0x6ec   :  { %1811 = vsyncpa [#allocation9], 1 }
 0x6ed   :  { %1812 = vsyncpa [#allocation12], 1 }
 0x6ee   :  { %1813 = vsyncpa [#allocation15], 1 }
 0x6ef   :  { %1814 = vsyncpa [#allocation18], 1 }
 0x6f0   :  { %1815 = vsyncpa [#allocation4], 1 }
 0x6f1   :  { %1817 = vsyncpa [#allocation4 + $0x1], 1 }

</bundles_post_ra>
